<compile_context>
chip_gen: v5e
topology: v5e:2x2
jax: 0.10.0
libtpu: 0.0.40
codegen_flags: <defaults>
</compile_context>

<pallas_src>
import jax
import jax.numpy as jnp
from jax import lax
from jax.experimental import pallas as pl
from jax.experimental.pallas import tpu as pltpu


def _round_up(x, m):
    return ((x + m - 1) // m) * m


# ----------------------------- Pallas kernel ------------------------------- #

def _make_fused_kernel(W, KH1, KW1, KH2, KW2, W1c, W2c):
    """Fused conv(KH1xKW1, BN folded) -> conv(KH2xKW2) -> ReLU for one batch block.

    Layout: [channels (sublanes), batch-folded flattened spatial (lanes)].
      x_ref : [Cin, Wxc]   bf16, per-image stride S, zero padded
      w1_ref: [C1, KH1*KW1*Cin]  bf16, BN scale folded, tap-major columns
      b1_ref: [C1, 1]      f32, (bias - mean)*scale + beta
      w2_ref: [C2, KH2*KW2*C1]   bf16
      b2_ref: [C2, 1]      f32
      o_ref : [C2, W2c]    f32, W2c = B_blk * S (valid positions extracted by wrapper)
      y1_ref: [C1, W1c]    bf16 VMEM scratch (conv1 activations)
    """
    taps1 = [(i, j) for i in range(KH1) for j in range(KW1)]
    taps2 = [(i, j) for i in range(KH2) for j in range(KW2)]

    def kernel(x_ref, w1_ref, b1_ref, w2_ref, b2_ref, o_ref, y1_ref):
        x = x_ref[...]                                            # [Cin, Wxc] bf16

        # ---- conv1 (3x3) + folded BatchNorm: ONE MXU matmul over stacked taps ----
        p1 = jnp.concatenate(
            [x[:, i * W + j: i * W + j + W1c] for (i, j) in taps1],
            axis=0)                                               # [KH1*KW1*Cin, W1c]
        y1 = jnp.dot(w1_ref[...], p1, preferred_element_type=jnp.float32)
        y1 = y1 + b1_ref[...]                                     # f32 bias/BN shift
        y1_ref[...] = y1.astype(jnp.bfloat16)                     # stage in VMEM scratch

        # ---- conv2 (5x5) + bias + ReLU: ONE MXU matmul over stacked taps ---------
        p2 = jnp.concatenate(
            [y1_ref[:, i * W + j: i * W + j + W2c] for (i, j) in taps2],
            axis=0)                                               # [KH2*KW2*C1, W2c]
        y2 = jnp.dot(w2_ref[...], p2, preferred_element_type=jnp.float32)
        y2 = y2 + b2_ref[...]
        o_ref[...] = jnp.maximum(y2, 0.0).astype(o_ref.dtype)

    return kernel


# ------------------------------ JAX wrapper -------------------------------- #

def mixed_precision_net(x_nchw, params, *, batch_block=None):
    """Forward pass. Input/output are NCHW float32 (PyTorch convention)."""
    N, Cin, H, W = x_nchw.shape
    C1, _, KH1, KW1 = params["w1"].shape          # (3, Cin, 3, 3)
    C2, _, KH2, KW2 = params["w2"].shape          # (4, C1, 5, 5)
    H1, W1 = H - KH1 + 1, W - KW1 + 1
    H2, W2 = H1 - KH2 + 1, W1 - KW2 + 1
    HW = H * W

    # Maximum in-image shifts used by each conv's tap slices.
    max_off1 = (KH1 - 1) * W + (KW1 - 1)
    max_off2 = (KH2 - 1) * W + (KW2 - 1)

    # Per-image lane stride (multiple of 128).  All reads needed by *valid* outputs
    # stay at flat positions < H*W, so S = round_up(H*W, 128) is sufficient.
    S = _round_up(HW, 128)

    # Images per grid step: amortise per-step overhead, keep >=512 lanes per matmul
    # where possible.  TODO(synk): re-derive this cap against v7x's 64 MiB VMEM for
    # production H*W (spatial tiling with halo if a single image no longer fits).
    if batch_block is None:
        batch_block = max(1, min(N, 1024 // S, 8))
    B = int(batch_block)
    NB = -(-N // B)
    Npad = NB * B

    W2c = B * S                                   # conv2 output width (mult of 128)
    W1c = W2c + _round_up(max_off2, 128)          # conv1 output width (covers conv2 taps)
    Wxc = W1c + _round_up(max_off1, 128)          # padded input width (covers conv1 taps)

    # --- trace-time folding: eval-mode BatchNorm + conv1 bias into weights (f32) ---
    eps = 1e-5
    f32 = jnp.float32
    bn_scale = params["bn_gamma"].astype(f32) * lax.rsqrt(params["bn_var"].astype(f32) + eps)
    w1_eff = params["w1"].astype(f32) * bn_scale[:, None, None, None]
    b1_eff = (params["b1"].astype(f32) - params["bn_mean"].astype(f32)) * bn_scale \
        + params["bn_beta"].astype(f32)
    # tap-major columns: col (i*KW + j)*C + c  <->  weight[:, c, i, j]
    w1_mat = jnp.transpose(w1_eff, (0, 2, 3, 1)).reshape(C1, KH1 * KW1 * Cin)
    w2_mat = jnp.transpose(params["w2"].astype(f32), (0, 2, 3, 1)).reshape(C2, KH2 * KW2 * C1)
    w1_mat = w1_mat.astype(jnp.bfloat16)          # cast AFTER folding in f32
    w2_mat = w2_mat.astype(jnp.bfloat16)
    b1_col = b1_eff[:, None]                      # f32
    b2_col = params["b2"].astype(f32)[:, None]    # f32

    # --- activations: [NB, Cin, Wxc] bf16, batch folded onto lanes with stride S ---
    x = x_nchw.reshape(N, Cin, HW).astype(jnp.bfloat16)
    x = jnp.pad(x, ((0, Npad - N), (0, 0), (0, S - HW)))            # [Npad, Cin, S]
    x = x.reshape(NB, B, Cin, S).transpose(0, 2, 1, 3).reshape(NB, Cin, B * S)
    x = jnp.pad(x, ((0, 0), (0, 0), (0, Wxc - B * S)))              # [NB, Cin, Wxc]

    kernel = _make_fused_kernel(W, KH1, KW1, KH2, KW2, W1c, W2c)

    out = pl.pallas_call(
        kernel,
        out_shape=jax.ShapeDtypeStruct((NB, C2, W2c), jnp.float32),
        grid=(NB,),
        in_specs=[
            pl.BlockSpec((None, Cin, Wxc), lambda n: (n, 0, 0)),
            pl.BlockSpec((C1, KH1 * KW1 * Cin), lambda n: (0, 0)),
            pl.BlockSpec((C1, 1), lambda n: (0, 0)),
            pl.BlockSpec((C2, KH2 * KW2 * C1), lambda n: (0, 0)),
            pl.BlockSpec((C2, 1), lambda n: (0, 0)),
        ],
        out_specs=pl.BlockSpec((None, C2, W2c), lambda n: (n, 0, 0)),
        scratch_shapes=[pltpu.VMEM((C1, W1c), jnp.bfloat16)],
        compiler_params=pltpu.CompilerParams(
            dimension_semantics=("parallel",)),
    )(x, w1_mat, b1_col, w2_mat, b2_col)

    # Unfold batch from lanes and keep only valid conv2 outputs.
    out = out.reshape(NB, C2, B, S).transpose(0, 2, 1, 3).reshape(Npad, C2, S)
    out = out[:N, :, :HW].reshape(N, C2, H, W)[:, :, :H2, :W2]
    return out


# ------------------------- reference (for sanity) --------------------------- #

def _reference(x_nchw, params):
    dn = lax.conv_dimension_numbers(x_nchw.shape, params["w1"].shape,
                                    ("NCHW", "OIHW", "NCHW"))
    y = lax.conv_general_dilated(x_nchw, params["w1"], (1, 1), "VALID",
                                 dimension_numbers=dn)
    y = y + params["b1"][None, :, None, None]
    eps = 1e-5
    scale = params["bn_gamma"] / jnp.sqrt(params["bn_var"] + eps)
    shift = params["bn_beta"] - params["bn_mean"] * scale
    y = y * scale[None, :, None, None] + shift[None, :, None, None]
    dn2 = lax.conv_dimension_numbers(y.shape, params["w2"].shape,
                                     ("NCHW", "OIHW", "NCHW"))
    y = lax.conv_general_dilated(y, params["w2"], (1, 1), "VALID",
                                 dimension_numbers=dn2)
    y = y + params["b2"][None, :, None, None]
    return jnp.maximum(y, 0.0)


# --------------------------------- main ------------------------------------ #

if __name__ == "__main__":
    key = jax.random.PRNGKey(0)
    ks = jax.random.split(key, 8)

    N, Cin, H, W = 2, 4, 16, 16
    x = jax.random.normal(ks[0], (N, Cin, H, W), dtype=jnp.float32)

    params = {
        # conv1: Conv2d(Cin, 3, kernel_size=3) -> weight OIHW [3, Cin, 3, 3], bias [3]
        "w1": 0.1 * jax.random.normal(ks[1], (3, Cin, 3, 3), dtype=jnp.float32),
        "b1": 0.1 * jax.random.normal(ks[2], (3,), dtype=jnp.float32),
        # BatchNorm2d(3) eval-mode parameters / running stats
        "bn_gamma": 1.0 + 0.1 * jax.random.normal(ks[3], (3,), dtype=jnp.float32),
        "bn_beta": 0.1 * jax.random.normal(ks[4], (3,), dtype=jnp.float32),
        "bn_mean": 0.1 * jax.random.normal(ks[5], (3,), dtype=jnp.float32),
        "bn_var": jnp.abs(jax.random.normal(ks[6], (3,), dtype=jnp.float32)) + 0.5,
        # conv2: Conv2d(3, 4, kernel_size=5) -> weight OIHW [4, 3, 5, 5], bias [4]
        "w2": 0.1 * jax.random.normal(ks[7], (4, 3, 5, 5), dtype=jnp.float32),
        "b2": jnp.linspace(-0.1, 0.1, 4, dtype=jnp.float32),
    }

    out = jax.jit(mixed_precision_net)(x, params)
    out = jax.block_until_ready(out)

    ref = _reference(x, params)
    assert out.shape == (N, 4, H - 2 - 4, W - 2 - 4), out.shape
    max_err = float(jnp.max(jnp.abs(out - ref)))
    # bf16 MXU operands (f32 accumulation) -> tolerance loosened per review.
    assert jnp.allclose(out, ref, atol=5e-2, rtol=5e-2), max_err

    print("KERNEL_OK")
</pallas_src>

<mosaic_0001>
module attributes {stable_mosaic.version = 11 : i64} {
  func.func @kernel(%arg0: i32, %arg1: memref<1x4x768xbf16, #tpu.memory_space<vmem>>, %arg2: memref<3x36xbf16, #tpu.memory_space<vmem>>, %arg3: memref<3x1xf32, #tpu.memory_space<vmem>>, %arg4: memref<4x75xbf16, #tpu.memory_space<vmem>>, %arg5: memref<4x1xf32, #tpu.memory_space<vmem>>, %arg6: memref<1x4x512xf32, #tpu.memory_space<vmem>>, %arg7: memref<3x640xbf16, #tpu.memory_space<vmem>>) attributes {dimension_semantics = [#tpu.dimension_semantics<parallel>], iteration_bounds = array<i64: 1>, scalar_prefetch = 0 : i64, scratch_operands = 1 : i64, tpu.core_type = #tpu.core_type<tc>, window_params = [{transform_indices = @transform_0, window_bounds = array<i64: 1, 4, 768>}, {pipeline_mode = #tpu.pipeline_mode<synchronous>, transform_indices = @transform_1, window_bounds = array<i64: 3, 36>}, {pipeline_mode = #tpu.pipeline_mode<synchronous>, transform_indices = @transform_2, window_bounds = array<i64: 3, 1>}, {pipeline_mode = #tpu.pipeline_mode<synchronous>, transform_indices = @transform_3, window_bounds = array<i64: 4, 75>}, {pipeline_mode = #tpu.pipeline_mode<synchronous>, transform_indices = @transform_4, window_bounds = array<i64: 4, 1>}, {transform_indices = @transform_5, window_bounds = array<i64: 1, 4, 512>}]} {
    %c0 = arith.constant 0 : index
    %c0_0 = arith.constant 0 : index
    %c0_1 = arith.constant 0 : index
    %0 = vector.load %arg1[%c0, %c0_0, %c0_1] : memref<1x4x768xbf16, #tpu.memory_space<vmem>>, vector<1x4x768xbf16>
    %1 = vector.shape_cast %0 : vector<1x4x768xbf16> to vector<4x768xbf16>
    %2 = vector.extract_strided_slice %1 {offsets = [0, 0], sizes = [4, 640], strides = [1, 1]} : vector<4x768xbf16> to vector<4x640xbf16>
    %3 = vector.extract_strided_slice %1 {offsets = [0, 1], sizes = [4, 640], strides = [1, 1]} : vector<4x768xbf16> to vector<4x640xbf16>
    %4 = vector.extract_strided_slice %1 {offsets = [0, 2], sizes = [4, 640], strides = [1, 1]} : vector<4x768xbf16> to vector<4x640xbf16>
    %5 = vector.extract_strided_slice %1 {offsets = [0, 16], sizes = [4, 640], strides = [1, 1]} : vector<4x768xbf16> to vector<4x640xbf16>
    %6 = vector.extract_strided_slice %1 {offsets = [0, 17], sizes = [4, 640], strides = [1, 1]} : vector<4x768xbf16> to vector<4x640xbf16>
    %7 = vector.extract_strided_slice %1 {offsets = [0, 18], sizes = [4, 640], strides = [1, 1]} : vector<4x768xbf16> to vector<4x640xbf16>
    %8 = vector.extract_strided_slice %1 {offsets = [0, 32], sizes = [4, 640], strides = [1, 1]} : vector<4x768xbf16> to vector<4x640xbf16>
    %9 = vector.extract_strided_slice %1 {offsets = [0, 33], sizes = [4, 640], strides = [1, 1]} : vector<4x768xbf16> to vector<4x640xbf16>
    %10 = vector.extract_strided_slice %1 {offsets = [0, 34], sizes = [4, 640], strides = [1, 1]} : vector<4x768xbf16> to vector<4x640xbf16>
    %11 = tpu.concatenate %2, %3, %4, %5, %6, %7, %8, %9, %10 in 0 : vector<4x640xbf16>, vector<4x640xbf16>, vector<4x640xbf16>, vector<4x640xbf16>, vector<4x640xbf16>, vector<4x640xbf16>, vector<4x640xbf16>, vector<4x640xbf16>, vector<4x640xbf16> -> vector<36x640xbf16>
    %c0_2 = arith.constant 0 : index
    %c0_3 = arith.constant 0 : index
    %12 = vector.load %arg2[%c0_2, %c0_3] : memref<3x36xbf16, #tpu.memory_space<vmem>>, vector<3x36xbf16>
    %cst = arith.constant dense<0.000000e+00> : vector<3x640xf32>
    %13 = tpu.matmul %12, %11, %cst {dimension_numbers = #tpu.dot_dimension_numbers<[1], [0], [0], [1], [0, 0, 1, 1], [], []>} : vector<3x36xbf16>, vector<36x640xbf16>, vector<3x640xf32> -> vector<3x640xf32>
    %c0_4 = arith.constant 0 : index
    %c0_5 = arith.constant 0 : index
    %14 = vector.load %arg3[%c0_4, %c0_5] : memref<3x1xf32, #tpu.memory_space<vmem>>, vector<3x1xf32>
    %15 = vector.broadcast %14 : vector<3x1xf32> to vector<3x640xf32>
    %16 = arith.addf %13, %15 : vector<3x640xf32>
    %17 = arith.truncf %16 : vector<3x640xf32> to vector<3x640xbf16>
    %c0_6 = arith.constant 0 : index
    %c0_7 = arith.constant 0 : index
    %18 = vector.load %arg7[%c0_6, %c0_7] : memref<3x640xbf16, #tpu.memory_space<vmem>>, vector<3x640xbf16>
    tpu.vector_store %arg7[%c0_6, %c0_7], %17 {strides = array<i32>} : memref<3x640xbf16, #tpu.memory_space<vmem>>, vector<3x640xbf16>,
    %c0_8 = arith.constant 0 : index
    %c0_9 = arith.constant 0 : index
    %19 = vector.load %arg7[%c0_8, %c0_9] : memref<3x640xbf16, #tpu.memory_space<vmem>>, vector<3x512xbf16>
    %c0_10 = arith.constant 0 : index
    %c1 = arith.constant 1 : index
    %20 = vector.load %arg7[%c0_10, %c1] : memref<3x640xbf16, #tpu.memory_space<vmem>>, vector<3x512xbf16>
    %c0_11 = arith.constant 0 : index
    %c2 = arith.constant 2 : index
    %21 = vector.load %arg7[%c0_11, %c2] : memref<3x640xbf16, #tpu.memory_space<vmem>>, vector<3x512xbf16>
    %c0_12 = arith.constant 0 : index
    %c3 = arith.constant 3 : index
    %22 = vector.load %arg7[%c0_12, %c3] : memref<3x640xbf16, #tpu.memory_space<vmem>>, vector<3x512xbf16>
    %c0_13 = arith.constant 0 : index
    %c4 = arith.constant 4 : index
    %23 = vector.load %arg7[%c0_13, %c4] : memref<3x640xbf16, #tpu.memory_space<vmem>>, vector<3x512xbf16>
    %c0_14 = arith.constant 0 : index
    %c16 = arith.constant 16 : index
    %24 = vector.load %arg7[%c0_14, %c16] : memref<3x640xbf16, #tpu.memory_space<vmem>>, vector<3x512xbf16>
    %c0_15 = arith.constant 0 : index
    %c17 = arith.constant 17 : index
    %25 = vector.load %arg7[%c0_15, %c17] : memref<3x640xbf16, #tpu.memory_space<vmem>>, vector<3x512xbf16>
    %c0_16 = arith.constant 0 : index
    %c18 = arith.constant 18 : index
    %26 = vector.load %arg7[%c0_16, %c18] : memref<3x640xbf16, #tpu.memory_space<vmem>>, vector<3x512xbf16>
    %c0_17 = arith.constant 0 : index
    %c19 = arith.constant 19 : index
    %27 = vector.load %arg7[%c0_17, %c19] : memref<3x640xbf16, #tpu.memory_space<vmem>>, vector<3x512xbf16>
    %c0_18 = arith.constant 0 : index
    %c20 = arith.constant 20 : index
    %28 = vector.load %arg7[%c0_18, %c20] : memref<3x640xbf16, #tpu.memory_space<vmem>>, vector<3x512xbf16>
    %c0_19 = arith.constant 0 : index
    %c32 = arith.constant 32 : index
    %29 = vector.load %arg7[%c0_19, %c32] : memref<3x640xbf16, #tpu.memory_space<vmem>>, vector<3x512xbf16>
    %c0_20 = arith.constant 0 : index
    %c33 = arith.constant 33 : index
    %30 = vector.load %arg7[%c0_20, %c33] : memref<3x640xbf16, #tpu.memory_space<vmem>>, vector<3x512xbf16>
    %c0_21 = arith.constant 0 : index
    %c34 = arith.constant 34 : index
    %31 = vector.load %arg7[%c0_21, %c34] : memref<3x640xbf16, #tpu.memory_space<vmem>>, vector<3x512xbf16>
    %c0_22 = arith.constant 0 : index
    %c35 = arith.constant 35 : index
    %32 = vector.load %arg7[%c0_22, %c35] : memref<3x640xbf16, #tpu.memory_space<vmem>>, vector<3x512xbf16>
    %c0_23 = arith.constant 0 : index
    %c36 = arith.constant 36 : index
    %33 = vector.load %arg7[%c0_23, %c36] : memref<3x640xbf16, #tpu.memory_space<vmem>>, vector<3x512xbf16>
    %c0_24 = arith.constant 0 : index
    %c48 = arith.constant 48 : index
    %34 = vector.load %arg7[%c0_24, %c48] : memref<3x640xbf16, #tpu.memory_space<vmem>>, vector<3x512xbf16>
    %c0_25 = arith.constant 0 : index
    %c49 = arith.constant 49 : index
    %35 = vector.load %arg7[%c0_25, %c49] : memref<3x640xbf16, #tpu.memory_space<vmem>>, vector<3x512xbf16>
    %c0_26 = arith.constant 0 : index
    %c50 = arith.constant 50 : index
    %36 = vector.load %arg7[%c0_26, %c50] : memref<3x640xbf16, #tpu.memory_space<vmem>>, vector<3x512xbf16>
    %c0_27 = arith.constant 0 : index
    %c51 = arith.constant 51 : index
    %37 = vector.load %arg7[%c0_27, %c51] : memref<3x640xbf16, #tpu.memory_space<vmem>>, vector<3x512xbf16>
    %c0_28 = arith.constant 0 : index
    %c52 = arith.constant 52 : index
    %38 = vector.load %arg7[%c0_28, %c52] : memref<3x640xbf16, #tpu.memory_space<vmem>>, vector<3x512xbf16>
    %c0_29 = arith.constant 0 : index
    %c64 = arith.constant 64 : index
    %39 = vector.load %arg7[%c0_29, %c64] : memref<3x640xbf16, #tpu.memory_space<vmem>>, vector<3x512xbf16>
    %c0_30 = arith.constant 0 : index
    %c65 = arith.constant 65 : index
    %40 = vector.load %arg7[%c0_30, %c65] : memref<3x640xbf16, #tpu.memory_space<vmem>>, vector<3x512xbf16>
    %c0_31 = arith.constant 0 : index
    %c66 = arith.constant 66 : index
    %41 = vector.load %arg7[%c0_31, %c66] : memref<3x640xbf16, #tpu.memory_space<vmem>>, vector<3x512xbf16>
    %c0_32 = arith.constant 0 : index
    %c67 = arith.constant 67 : index
    %42 = vector.load %arg7[%c0_32, %c67] : memref<3x640xbf16, #tpu.memory_space<vmem>>, vector<3x512xbf16>
    %c0_33 = arith.constant 0 : index
    %c68 = arith.constant 68 : index
    %43 = vector.load %arg7[%c0_33, %c68] : memref<3x640xbf16, #tpu.memory_space<vmem>>, vector<3x512xbf16>
    %44 = tpu.concatenate %19, %20, %21, %22, %23, %24, %25, %26, %27, %28, %29, %30, %31, %32, %33, %34 in 0 : vector<3x512xbf16>, vector<3x512xbf16>, vector<3x512xbf16>, vector<3x512xbf16>, vector<3x512xbf16>, vector<3x512xbf16>, vector<3x512xbf16>, vector<3x512xbf16>, vector<3x512xbf16>, vector<3x512xbf16>, vector<3x512xbf16>, vector<3x512xbf16>, vector<3x512xbf16>, vector<3x512xbf16>, vector<3x512xbf16>, vector<3x512xbf16> -> vector<48x512xbf16>
    %45 = tpu.concatenate %35, %36, %37, %38, %39, %40, %41, %42, %43 in 0 : vector<3x512xbf16>, vector<3x512xbf16>, vector<3x512xbf16>, vector<3x512xbf16>, vector<3x512xbf16>, vector<3x512xbf16>, vector<3x512xbf16>, vector<3x512xbf16>, vector<3x512xbf16> -> vector<27x512xbf16>
    %46 = tpu.concatenate %44, %45 in 0 : vector<48x512xbf16>, vector<27x512xbf16> -> vector<75x512xbf16>
    %c0_34 = arith.constant 0 : index
    %c0_35 = arith.constant 0 : index
    %47 = vector.load %arg4[%c0_34, %c0_35] : memref<4x75xbf16, #tpu.memory_space<vmem>>, vector<4x75xbf16>
    %cst_36 = arith.constant dense<0.000000e+00> : vector<4x512xf32>
    %48 = tpu.matmul %47, %46, %cst_36 {dimension_numbers = #tpu.dot_dimension_numbers<[1], [0], [0], [1], [0, 0, 1, 1], [], []>} : vector<4x75xbf16>, vector<75x512xbf16>, vector<4x512xf32> -> vector<4x512xf32>
    %c0_37 = arith.constant 0 : index
    %c0_38 = arith.constant 0 : index
    %49 = vector.load %arg5[%c0_37, %c0_38] : memref<4x1xf32, #tpu.memory_space<vmem>>, vector<4x1xf32>
    %50 = vector.broadcast %49 : vector<4x1xf32> to vector<4x512xf32>
    %51 = arith.addf %48, %50 : vector<4x512xf32>
    %cst_39 = arith.constant 0.000000e+00 : f32
    %52 = vector.broadcast %cst_39 : f32 to vector<4x512xf32>
    %53 = arith.maximumf %51, %52 : vector<4x512xf32>
    %c0_40 = arith.constant 0 : index
    %c0_41 = arith.constant 0 : index
    %c0_42 = arith.constant 0 : index
    %54 = vector.load %arg6[%c0_40, %c0_41, %c0_42] : memref<1x4x512xf32, #tpu.memory_space<vmem>>, vector<1x4x512xf32>
    %55 = vector.shape_cast %54 : vector<1x4x512xf32> to vector<4x512xf32>
    %56 = vector.shape_cast %53 : vector<4x512xf32> to vector<1x4x512xf32>
    tpu.vector_store %arg6[%c0_40, %c0_41, %c0_42], %56 {strides = array<i32>} : memref<1x4x512xf32, #tpu.memory_space<vmem>>, vector<1x4x512xf32>,
    return
  }
  func.func @transform_0(%arg0: i32) -> (i32, i32, i32) {
    %c0_i32 = arith.constant 0 : i32
    %c0_i32_0 = arith.constant 0 : i32
    %c0_i32_1 = arith.constant 0 : i32
    return %arg0, %c0_i32, %c0_i32_0 : i32, i32, i32
  }
  func.func @transform_1(%arg0: i32) -> (i32, i32) {
    %c0_i32 = arith.constant 0 : i32
    %c0_i32_0 = arith.constant 0 : i32
    %c0_i32_1 = arith.constant 0 : i32
    return %c0_i32, %c0_i32_0 : i32, i32
  }
  func.func @transform_2(%arg0: i32) -> (i32, i32) {
    %c0_i32 = arith.constant 0 : i32
    %c0_i32_0 = arith.constant 0 : i32
    %c0_i32_1 = arith.constant 0 : i32
    return %c0_i32, %c0_i32_0 : i32, i32
  }
  func.func @transform_3(%arg0: i32) -> (i32, i32) {
    %c0_i32 = arith.constant 0 : i32
    %c0_i32_0 = arith.constant 0 : i32
    %c0_i32_1 = arith.constant 0 : i32
    return %c0_i32, %c0_i32_0 : i32, i32
  }
  func.func @transform_4(%arg0: i32) -> (i32, i32) {
    %c0_i32 = arith.constant 0 : i32
    %c0_i32_0 = arith.constant 0 : i32
    %c0_i32_1 = arith.constant 0 : i32
    return %c0_i32, %c0_i32_0 : i32, i32
  }
  func.func @transform_5(%arg0: i32) -> (i32, i32, i32) {
    %c0_i32 = arith.constant 0 : i32
    %c0_i32_0 = arith.constant 0 : i32
    %c0_i32_1 = arith.constant 0 : i32
    return %arg0, %c0_i32, %c0_i32_0 : i32, i32, i32
  }
}

</mosaic_0001>

<bundles_post_ra>
// kernel: mixed_precision_net.1
= control target key start
LH: loop header
LB: loop body
LE: loop exit
PB: predicated region body
PF: predicated region fallthrough
CT: control target
= control target key end

     0   :  { %s2092_s22 = smov 111   ;;  %s2093_s23 = smov 110   ;;  %vm3560_vm0 = vcmask 769024   ;;  %vm303_vm1 = vcmask 1041408   ;;  %vm3564_vm2 = vcmask 908288   ;;  %vm3563_vm3 = vcmask 900096   ;;  %s3554_s0 = inlined_call_operand.vmem [shape: bf16[1,4,768], index: 0, kind: input, shape index: {}]   ;;  %s3555_s2 = inlined_call_operand.vmem [shape: f32[3,1], index: 2, kind: input, shape index: {}]   ;;  %s3556_s1 = inlined_call_operand.vmem [shape: bf16[3,36], index: 1, kind: input, shape index: {}]   ;;  %s3557_s4 = inlined_call_operand.vmem [shape: f32[4,1], index: 4, kind: input, shape index: {}]   ;;  %s3558_s3 = inlined_call_operand.vmem [shape: bf16[4,75], index: 3, kind: input, shape index: {}]   ;;  %s3559_s5 = inlined_call_operand.vmem [shape: f32[1,4,512], index: 5, kind: output, shape index: {}]  }
   0x1   :  { %v2143_v0 = vld [vmem:[%s3554_s0] sm:$0xff]  ;;  %v2148_v1 = vld [vmem:[%s3554_s0 + $0x8] sm:$0xf]  ;;  %s2091_s0 = smov 127   ;;  %s2094_s24 = smov 96   ;;  %vm3562_vm4 = vcmask 785408  }
   0x2   :  { %24 = vst [vmem:[#allocation1] ss:$4 sm:$0xff] %v2143_v0  ;;  %s2095_s25 = smov 95   ;;  %s2096_s26 = smov 94   ;;  %vm3561_vm5 = vcmask 777216   ;;  %vm3566_vm6 = vcmask 1045504  }
   0x3   :  { %27 = vst [vmem:[#allocation1 + $0x20] ss:$4 sm:$0xff] %v2148_v1  ;;  %s2097_s27 = smov 126   ;;  %s2098_s28 = smov 112   ;;  %vm314_vm7 = vcmask 1043456   ;;  %vm61_vm8 = vcmask 1039360  }
   0x4   :  { %vm3565_vm9 = vcmask 916480   ;;  %vm3578_vm10 = vcmask 1031168   ;;  %vm388_vm11 = vcmask 293888   ;;  %vm496_vm12 = vsmask.f32 1280  ;;  %s2102_s8 = smov 109  }
   0x5   :  { %vm498_vm13 = vcmask 1043458   ;;  %vm499_vm14 = vsmask.f32 3328  ;;  %vm2416_vm15 = vmand %vm303_vm1, %vm496_vm12  ;;  %vm507_vm12 = vsmask.f32 7424  ;;  %s2103_s9 = smov 108  }
   0x6   :  { %s2104_s10 = smov 93   ;;  %s2105_s11 = smov 92  }
   0x7   :  { %s2106_s12 = smov 113   ;;  %s2107_s13 = smov 80  }
   0x8   :  { %s2108_s14 = smov 79  }
   0x9   :  { %v2152_v2 = vld.sshfl [vmem:[#allocation1] sm:$0xff pattern:$0x73625140]  ;;  %v2154_v3 = vld.sshfl [vmem:[#allocation1 + $0x8] sm:$0xff pattern:$0x73625140] }
   0xa   :  { %v2156_v4 = vld.sshfl [vmem:[#allocation1 + $0x10] sm:$0xff pattern:$0x73625140]  ;;  %v2158_v5 = vld.sshfl [vmem:[#allocation1 + $0x18] sm:$0xff pattern:$0x73625140] }
   0xb   :  { %34 = vst [vmem:[#allocation1 + $0x1] ss:$4 sm:$0xff] %v2143_v0  ;;  %v2161_v6 = vld.sshfl [vmem:[#allocation1 + $0x20] sm:$0xff pattern:$0x73625140] }
   0xc   :  { %36 = vst [vmem:[#allocation1 + $0x21] ss:$4 sm:$0xff] %v2148_v1 }
  0x12   :  { %v37_v7 = vld.sshfl [vmem:[#allocation1] sm:$0xff pattern:$0x73625140]  ;;  %v41_v8 = vld.sshfl [vmem:[#allocation1 + $0x10] sm:$0xff pattern:$0x73625140] }
  0x13   :  { %49 = vrot.lane.b32.xlu1 %v37_v7, %s2091_s0  ;;  %53 = vrot.lane.b32.xlu0 %v41_v8, %s2091_s0  ;;  %v39_v9 = vld.sshfl [vmem:[#allocation1 + $0x8] sm:$0xff pattern:$0x73625140]  ;;  %v43_v10 = vld.sshfl [vmem:[#allocation1 + $0x18] sm:$0xff pattern:$0x73625140] }
  0x14   :  { %51 = vrot.lane.b32.xlu2 %v39_v9, %s2091_s0  ;;  %68 = vst [vmem:[#allocation1 + $0x2] ss:$4 sm:$0xff] %v2143_v0  ;;  %v2168_v11 = vld.sshfl [vmem:[#allocation1 + $0x20] sm:$0xff pattern:$0x73625140] }
  0x15   :  { %v2170_v12 = vld.sshfl [vmem:[#allocation1 + $0x28] sm:$0xff pattern:$0x73625140] }
  0x16   :  { %70 = vst [vmem:[#allocation1 + $0x22] ss:$4 sm:$0xff] %v2148_v1 }
  0x1b   :  { %55 = vrot.lane.b32.xlu1 %v43_v10, %s2091_s0  ;;  %v2174_v13 = vld.sshfl [vmem:[#allocation1] sm:$0xff pattern:$0x73625140]  ;;  %v2176_v14 = vld.sshfl [vmem:[#allocation1 + $0x8] sm:$0xff pattern:$0x73625140] }
  0x1c   :  { %v2178_v15 = vld.sshfl [vmem:[#allocation1 + $0x10] sm:$0xff pattern:$0x73625140]  ;;  %v2180_v16 = vld.sshfl [vmem:[#allocation1 + $0x18] sm:$0xff pattern:$0x73625140] }
  0x1d   :  { %102 = vst [vmem:[#allocation1 + $0x3] ss:$4 sm:$0xff] %v2143_v0  ;;  %v2183_v17 = vld.sshfl [vmem:[#allocation1 + $0x20] sm:$0xff pattern:$0x73625140] }
  0x1e   :  { %v2185_v18 = vld.sshfl [vmem:[#allocation1 + $0x28] sm:$0xff pattern:$0x73625140] }
  0x1f   :  { %104 = vst [vmem:[#allocation1 + $0x23] ss:$4 sm:$0xff] %v2148_v1 }
  0x24   :  { %v2188_v19 = vld.sshfl [vmem:[#allocation1] sm:$0xff pattern:$0x73625140]  ;;  %v2190_v20 = vld.sshfl [vmem:[#allocation1 + $0x8] sm:$0xff pattern:$0x73625140] }
  0x25   :  { %v2192_v21 = vld.sshfl [vmem:[#allocation1 + $0x10] sm:$0xff pattern:$0x73625140]  ;;  %v2194_v22 = vld.sshfl [vmem:[#allocation1 + $0x18] sm:$0xff pattern:$0x73625140] }
  0x26   :  { %135 = vst [vmem:[#allocation1] ss:$4 sm:$0xff] %v2143_v0  ;;  %v2197_v23 = vld.sshfl [vmem:[#allocation1 + $0x20] sm:$0xff pattern:$0x73625140] }
  0x27   :  { %v2199_v24 = vld.sshfl [vmem:[#allocation1 + $0x28] sm:$0xff pattern:$0x73625140] }
  0x28   :  { %137 = vst [vmem:[#allocation1 + $0x20] ss:$4 sm:$0xff] %v2148_v1 }
  0x2d   :  { %v144_v25 = vld.sshfl [vmem:[#allocation1 + $0x18] sm:$0xff pattern:$0x73625140]  ;;  %v140_v26 = vld.sshfl [vmem:[#allocation1 + $0x8] sm:$0xff pattern:$0x73625140] }
  0x2e   :  { %156 = vrot.lane.b32.xlu1 %v144_v25, %s2092_s22  ;;  %152 = vrot.lane.b32.xlu0 %v140_v26, %s2092_s22  ;;  %v138_v27 = vld.sshfl [vmem:[#allocation1] sm:$0xff pattern:$0x73625140]  ;;  %v142_v28 = vld.sshfl [vmem:[#allocation1 + $0x10] sm:$0xff pattern:$0x73625140] }
  0x2f   :  { %150 = vrot.lane.b32.xlu2 %v138_v27, %s2092_s22  ;;  %169 = vst [vmem:[#allocation1 + $0x1] ss:$4 sm:$0xff] %v2143_v0  ;;  %v146_v29 = vld.sshfl [vmem:[#allocation1 + $0x20] sm:$0xff pattern:$0x73625140] }
  0x30   :  { %v2206_v30 = vld.sshfl [vmem:[#allocation1 + $0x28] sm:$0xff pattern:$0x73625140] }
  0x31   :  { %171 = vst [vmem:[#allocation1 + $0x21] ss:$4 sm:$0xff] %v2148_v1 }
  0x36   :  { %154 = vrot.lane.b32.xlu0 %v142_v28, %s2092_s22  ;;  %v172_v31 = vld.sshfl [vmem:[#allocation1] sm:$0xff pattern:$0x73625140]  ;;  %v176_v32 = vld.sshfl [vmem:[#allocation1 + $0x10] sm:$0xff pattern:$0x73625140] }
  0x37   :  { %158 = vrot.lane.b32.xlu2 %v146_v29, %s2092_s22  ;;  %184 = vrot.lane.b32.xlu1 %v172_v31, %s2093_s23  ;;  %v174_v33 = vld.sshfl [vmem:[#allocation1 + $0x8] sm:$0xff pattern:$0x73625140]  ;;  %v178_v34 = vld.sshfl [vmem:[#allocation1 + $0x18] sm:$0xff pattern:$0x73625140] }
  0x38   :  { %203 = vst [vmem:[#allocation1 + $0x2] ss:$4 sm:$0xff] %v2143_v0  ;;  %v180_v35 = vld.sshfl [vmem:[#allocation1 + $0x20] sm:$0xff pattern:$0x73625140] }
  0x39   :  { %v2213_v36 = vld.sshfl [vmem:[#allocation1 + $0x28] sm:$0xff pattern:$0x73625140] }
  0x3a   :  { %205 = vst [vmem:[#allocation1 + $0x22] ss:$4 sm:$0xff] %v2148_v1 }
  0x3e   :  { %188 = vrot.lane.b32.xlu0 %v176_v32, %s2093_s23 }
  0x3f   :  { %186 = vrot.lane.b32.xlu2 %v174_v33, %s2093_s23  ;;  %190 = vrot.lane.b32.xlu1 %v178_v34, %s2093_s23  ;;  %v208_v37 = vld.sshfl [vmem:[#allocation1 + $0x8] sm:$0xff pattern:$0x73625140]  ;;  %v210_v38 = vld.sshfl [vmem:[#allocation1 + $0x10] sm:$0xff pattern:$0x73625140] }
  0x40   :  { %v212_v39 = vld.sshfl [vmem:[#allocation1 + $0x18] sm:$0xff pattern:$0x73625140]  ;;  %v206_v42 = vld.sshfl [vmem:[#allocation1] sm:$0xff pattern:$0x73625140] }
  0x41   :  { %v214_v40 = vld.sshfl [vmem:[#allocation1 + $0x20] sm:$0xff pattern:$0x73625140]  ;;  %v216_v41 = vld.sshfl [vmem:[#allocation1 + $0x28] sm:$0xff pattern:$0x73625140] }
  0x42   :  { %239 = vst [vmem:[#allocation1 + $0x23] ss:$4 sm:$0xff] %v2148_v1 }
  0x43   :  { %237 = vst [vmem:[#allocation1 + $0x3] ss:$4 sm:$0xff] %v2143_v0 }
  0x46   :  { %218 = vrot.lane.b32.xlu0 %v206_v42, %s2094_s24 }
  0x47   :  { %192 = vrot.lane.b32.xlu2 %v180_v35, %s2093_s23  ;;  %220 = vrot.lane.b32.xlu1 %v208_v37, %s2094_s24 }
  0x49   :  { %v248_v43 = vld.sshfl [vmem:[#allocation1 + $0x20] sm:$0xff pattern:$0x73625140]  ;;  %v250_v44 = vld.sshfl [vmem:[#allocation1 + $0x28] sm:$0xff pattern:$0x73625140] }
  0x4a   :  { %v244_v45 = vld.sshfl [vmem:[#allocation1 + $0x10] sm:$0xff pattern:$0x73625140]  ;;  %v242_v46 = vld.sshfl [vmem:[#allocation1 + $0x8] sm:$0xff pattern:$0x73625140] }
  0x4b   :  { %v240_v47 = vld.sshfl [vmem:[#allocation1] sm:$0xff pattern:$0x73625140]  ;;  %272 = vst [vmem:[#allocation1 + $0x20] ss:$4 sm:$0xff] %v2148_v1 }
  0x4c   :  { %v246_v48 = vld.sshfl [vmem:[#allocation1 + $0x18] sm:$0xff pattern:$0x73625140] }
  0x4d   :  { %270 = vst [vmem:[#allocation1] ss:$4 sm:$0xff] %v2143_v0 }
  0x4e   :  { %224 = vrot.lane.b32.xlu0 %v212_v39, %s2094_s24 }
  0x4f   :  { %222 = vrot.lane.b32.xlu2 %v210_v38, %s2094_s24  ;;  %226 = vrot.lane.b32.xlu1 %v214_v40, %s2094_s24 }
  0x52   :  { %v281_v53 = vld.sshfl [vmem:[#allocation1 + $0x20] sm:$0xff pattern:$0x73625140]  ;;  %v283_v55 = vld.sshfl [vmem:[#allocation1 + $0x28] sm:$0xff pattern:$0x73625140] }
  0x54   :  { %v277_v49 = vld.sshfl [vmem:[#allocation1 + $0x10] sm:$0xff pattern:$0x73625140]  ;;  %v273_v50 = vld.sshfl [vmem:[#allocation1] sm:$0xff pattern:$0x73625140] }
  0x55   :  { %v279_v51 = vld.sshfl [vmem:[#allocation1 + $0x18] sm:$0xff pattern:$0x73625140]  ;;  %v275_v52 = vld.sshfl [vmem:[#allocation1 + $0x8] sm:$0xff pattern:$0x73625140] }
  0x56   :  { %254 = vrot.lane.b32.xlu0 %v242_v46, %s2095_s25 }
  0x57   :  { %256 = vrot.lane.b32.xlu1 %v244_v45, %s2095_s25  ;;  %252 = vrot.lane.b32.xlu2 %v240_v47, %s2095_s25 }
  0x5e   :  { %260 = vrot.lane.b32.xlu0 %v248_v43, %s2095_s25 }
  0x5f   :  { %258 = vrot.lane.b32.xlu2 %v246_v48, %s2095_s25  ;;  %289 = vrot.lane.b32.xlu1 %v277_v49, %s2096_s26 }
  0x66   :  { %285 = vrot.lane.b32.xlu0 %v273_v50, %s2096_s26 }
  0x67   :  { %57 = vrot.lane.b32.xlu2 %v2168_v11, %s2091_s0  ;;  %291 = vrot.lane.b32.xlu1 %v279_v51, %s2096_s26 }
  0x6e   :  { %287 = vrot.lane.b32.xlu0 %v275_v52, %s2096_s26  ;;  %v2255_v54 = vpop.permute.xlu2 %51 }
  0x6f   :  { %293 = vrot.lane.b32.xlu2 %v281_v53, %s2096_s26  ;;  %85 = vrot.lane.b32.xlu1 %v2176_v14, %s2097_s27 }
  0x76   :  { %83 = vrot.lane.b32.xlu0 %v2174_v13, %s2097_s27 }
  0x77   :  { %87 = vrot.lane.b32.xlu2 %v2178_v15, %s2097_s27  ;;  %91 = vrot.lane.b32.xlu1 %v2183_v17, %s2097_s27 }
  0x7e   :  { %89 = vrot.lane.b32.xlu0 %v2180_v16, %s2097_s27 }
  0x7f   :  { %117 = vrot.lane.b32.xlu2 %v2188_v19, %s2098_s28  ;;  %121 = vrot.lane.b32.xlu1 %v2192_v21, %s2098_s28 }
  0x85   :  { %v2264_v57 = vpop.permute.xlu1 %49  ;;  %v2275_v59 = vpop.permute.xlu0 %53 }
  0x86   :  { %119 = vrot.lane.b32.xlu0 %v2190_v20, %s2098_s28 }
  0x87   :  { %123 = vrot.lane.b32.xlu2 %v2194_v22, %s2098_s28  ;;  %295 = vrot.lane.b32.xlu1 %v283_v55, %s2096_s26 }
  0x89   :  { %v2262_v56 = vpop.permute.xlu2 %150 }
  0x8d   :  { %v2277_v60 = vpop.permute.xlu1 %55 }
  0x8e   :  { %125 = vrot.lane.b32.xlu0 %v2197_v23, %s2098_s28 }
  0x8f   :  { %160 = vrot.lane.b32.xlu2 %v2206_v30, %s2092_s22  ;;  %228 = vrot.lane.b32.xlu1 %v216_v41, %s2094_s24 }
  0x91   :  { %v2271_v58 = vpop.permute.xlu2 %158 }
  0x96   :  { %194 = vrot.lane.b32.xlu0 %v2213_v36, %s2093_s23 }
  0x97   :  { %262 = vrot.lane.b32.xlu2 %v250_v44, %s2095_s25  ;;  %93 = vrot.lane.b32.xlu1 %v2185_v18, %s2097_s27 }
  0x99   :  { %v187_v61 = vpop.permute.xlu2 %186 }
  0x9e   :  { %59 = vrot.lane.b32.xlu0 %v2170_v12, %s2091_s0 }
  0x9f   :  { %127 = vrot.lane.b32.xlu2 %v2199_v24, %s2098_s28 }
  0xa0   :  { %v157_v62 = vpop.permute.xlu1 %156  ;;  %v2286_v63 = vpop.permute.xlu0 %152 }
  0xa1   :  { %v2288_v0 = vpop.permute.xlu2 %192  ;;  %v166_v24 = vsel %vm3564_vm2, %v157_v62, %v2271_v58  ;;  %v163_v44 = vsel %vm3564_vm2, %v2262_v56, %v2286_v63 }
  0xa8   :  { %v155_v1 = vpop.permute.xlu0 %154 }
  0xa9   :  { %v185_v7 = vpop.permute.xlu1 %184  ;;  %v223_v8 = vpop.permute.xlu2 %222  ;;  %v165_v34 = vsel %vm3564_vm2, %v155_v1, %v157_v62  ;;  %v164_v56 = vsel %vm3564_vm2, %v2286_v63, %v155_v1 }
  0xaa   :  { %v197_v46 = vsel %vm3563_vm3, %v185_v7, %v187_v61 }
  0xab   :  { %v343_v7 = vsel %vm303_vm1, %v163_v44, %v197_v46 }
  0xb0   :  { %v189_v9 = vpop.permute.xlu0 %188 }
  0xb1   :  { %v191_v10 = vpop.permute.xlu1 %190  ;;  %v253_v11 = vpop.permute.xlu2 %252  ;;  %v198_v47 = vsel %vm3563_vm3, %v187_v61, %v189_v9 }
  0xb2   :  { %v199_v26 = vsel %vm3563_vm3, %v189_v9, %v191_v10  ;;  %v200_v27 = vsel %vm3563_vm3, %v191_v10, %v2288_v0  ;;  %v346_v9 = vsel %vm303_vm1, %v164_v56, %v198_v47 }
  0xb3   :  { %v349_v38 = vsel %vm303_vm1, %v165_v34, %v199_v26  ;;  %v352_v39 = vsel %vm303_vm1, %v166_v24, %v200_v27  ;;  %v382_v26 = vld [vmem:[%s3555_s2] sm:$0x7]  ;;  %s2101_s2 = smov 124  }
  0xb8   :  { %v219_v13 = vpop.permute.xlu0 %218 }
  0xb9   :  { %v221_v14 = vpop.permute.xlu1 %220  ;;  %v259_v15 = vpop.permute.xlu2 %258 }
  0xba   :  { %v232_v51 = vsel %vm3562_vm4, %v221_v14, %v223_v8  ;;  %v231_v52 = vsel %vm3562_vm4, %v219_v13, %v221_v14 }
  0xbb   :  { %v359_v10 = vsel %vm314_vm7, %v346_v9, %v232_v51 }
  0xc0   :  { %v225_v16 = vpop.permute.xlu0 %224 }
  0xc1   :  { %v2290_v17 = vpop.permute.xlu1 %226  ;;  %v2292_v18 = vpop.permute.xlu2 %57  ;;  %v233_v30 = vsel %vm3562_vm4, %v223_v8, %v225_v16  ;;  %v357_v8 = vsel %vm314_vm7, %v343_v7, %v231_v52 }
  0xc2   :  { %v234_v31 = vsel %vm3562_vm4, %v225_v16, %v2290_v17  ;;  %v361_v40 = vsel %vm314_vm7, %v349_v38, %v233_v30  ;;  %v63_v30 = vsel %vm61_vm8, %v2255_v54, %v2275_v59 }
  0xc3   :  { %v363_v41 = vsel %vm314_vm7, %v352_v39, %v234_v31 }
  0xc8   :  { %v255_v12 = vpop.permute.xlu0 %254 }
  0xc9   :  { %v257_v19 = vpop.permute.xlu1 %256  ;;  %v2296_v22 = vpop.permute.xlu2 %293  ;;  %v265_v61 = vsel %vm3561_vm5, %v253_v11, %v255_v12  ;;  %v64_v11 = vsel %vm61_vm8, %v2275_v59, %v2277_v60 }
  0xca   :  { %v267_v35 = vsel %vm3561_vm5, %v257_v19, %v259_v15  ;;  %v266_v62 = vsel %vm3561_vm5, %v255_v12, %v257_v19  ;;  %v367_v13 = vsel %vm3566_vm6, %v357_v8, %v265_v61 }
  0xcb   :  { %v373_v42 = vsel %vm3566_vm6, %v361_v40, %v267_v35  ;;  %v370_v14 = vsel %vm3566_vm6, %v359_v10, %v266_v62  ;;  %v307_v35 = vsel %vm303_vm1, %v2154_v3, %v63_v30  ;;  %v65_v40 = vsel %vm61_vm8, %v2277_v60, %v2292_v18 }
  0xd0   :  { %v2294_v20 = vpop.permute.xlu0 %260 }
  0xd1   :  { %v290_v21 = vpop.permute.xlu1 %289  ;;  %v268_v36 = vsel %vm3561_vm5, %v259_v15, %v2294_v20  ;;  %v88_v37 = vpop.permute.xlu2 %87 }
  0xd2   :  { %v376_v43 = vsel %vm3566_vm6, %v363_v41, %v268_v36 }
  0xd8   :  { %v286_v23 = vpop.permute.xlu0 %285 }
  0xd9   :  { %v292_v25 = vpop.permute.xlu1 %291  ;;  %v118_v15 = vpop.permute.xlu2 %117 }
  0xda   :  { %v300_v28 = vsel %vm3560_vm0, %v290_v21, %v292_v25  ;;  %v301_v29 = vsel %vm3560_vm0, %v292_v25, %v2296_v22 }
  0xdb   :  { %v399_v32 = vsel %vm303_vm1, %v300_v28, 0  ;;  %v402_v33 = vsel %vm303_vm1, %v301_v29, 0  ;;  %v381_v28 = vld [vmem:[%s3556_s1] sm:$0x3]  ;;  %v2099_v29 = vmov 0   ;;  %s2100_s1 = smov 125  }
  0xdc   :  { %438 = vmatpush.bf16.msra.mxu2 %v399_v32  ;;  %451 = vmatpush.bf16.msra.mxu3 %v402_v33 }
  0xdd   :  { %2064 = vset.pattern.permute.xlu0 %v2099_v29 }
  0xde   :  { %385 = vperm.xlu0 %2064, %v382_v26  }
  0xe0   :  { %439 = vmatpush.bf16.msra.mxu2 %v373_v42  ;;  %452 = vmatpush.bf16.msra.mxu3 %v376_v43  ;;  %v288_v45 = vpop.permute.xlu0 %287 }
  0xe1   :  { %v86_v48 = vpop.permute.xlu1 %85  ;;  %v298_v49 = vsel %vm3560_vm0, %v286_v23, %v288_v45  ;;  %v299_v50 = vsel %vm3560_vm0, %v288_v45, %v290_v21  ;;  %v124_v12 = vpop.permute.xlu2 %123  ;;  %v309_v23 = vsel %vm303_vm1, %v2156_v4, %v64_v11  ;;  %v62_v4 = vsel %vm61_vm8, %v2264_v57, %v2255_v54 }
  0xe2   :  { %v393_v53 = vsel %vm303_vm1, %v298_v49, 0  ;;  %v396_v55 = vsel %vm303_vm1, %v299_v50, 0  ;;  %v97_v31 = vsel %vm3578_vm10, %v86_v48, %v88_v37  ;;  %v305_v33 = vsel %vm303_vm1, %v2152_v2, %v62_v4 }
  0xe3   :  { %412 = vmatpush.bf16.msra.mxu0 %v393_v53  ;;  %425 = vmatpush.bf16.msra.mxu1 %v396_v55  ;;  %v318_v59 = vsel %vm314_vm7, %v307_v35, %v97_v31 }
  0xe7   :  { %413 = vmatpush.bf16.msra.mxu0 %v367_v13  ;;  %426 = vmatpush.bf16.msra.mxu1 %v370_v14 }
  0xe8   :  { %v84_v63 = vpop.permute.xlu0 %83 }
  0xe9   :  { %v2342_v1 = vpop.permute.xlu1 %91  ;;  %v96_v32 = vsel %vm3578_vm10, %v84_v63, %v86_v48  ;;  %v161_v41 = vpop.permute.xlu2 %160 }
  0xea   :  { %v316_v54 = vsel %vm314_vm7, %v305_v33, %v96_v32  ;;  %v167_v49 = vsel %vm3564_vm2, %v2271_v58, %v161_v41  ;;  %vm506_vm2 = vcmask 1047558  }
  0xf0   :  { %v90_v16 = vpop.permute.xlu0 %89 }
  0xf1   :  { %v122_v19 = vpop.permute.xlu1 %121  ;;  %v98_v21 = vsel %vm3578_vm10, %v88_v37, %v90_v16  ;;  %v99_v42 = vsel %vm3578_vm10, %v90_v16, %v2342_v1  ;;  %v263_v47 = vpop.permute.xlu2 %262 }
  0xf2   :  { %v132_v24 = vsel %vm3565_vm9, %v122_v19, %v124_v12  ;;  %v320_v25 = vsel %vm314_vm7, %v309_v23, %v98_v21  ;;  %v269_v52 = vsel %vm3561_vm5, %v2294_v20, %v263_v47  ;;  %vm503_vm5 = vsmask.f32 5376 }
  0xf3   :  { %v333_v27 = vsel %vm3566_vm6, %v320_v25, %v132_v24 }
  0xf4   :  { %440 = vmatpush.bf16.msra.mxu2 %v333_v27  ;;  %v510_v27 = vld [vmem:[#allocation2] sm:$0xff] }
  0xf7   :  { %2038 = vmatmul.msk.bf16.vlgmr.msra.gmra.mxu2 %vm388_vm11, %v381_v28 }
  0xf8   :  { %v120_v34 = vpop.permute.xlu0 %119 }
  0xf9   :  { %v296_v36 = vpop.permute.xlu1 %295  ;;  %v130_v57 = vsel %vm3565_vm9, %v118_v15, %v120_v34  ;;  %v131_v38 = vsel %vm3565_vm9, %v120_v34, %v122_v19  ;;  %v128_v61 = vpop.permute.xlu2 %127 }
  0xfa   :  { %v327_v37 = vsel %vm3566_vm6, %v316_v54, %v130_v57  ;;  %v330_v39 = vsel %vm3566_vm6, %v318_v59, %v131_v38  ;;  %v302_v2 = vsel %vm3560_vm0, %v2296_v22, %v296_v36  ;;  %v311_v22 = vsel %vm303_vm1, %v2158_v5, %v65_v40  ;;  %vm500_vm0 = vmand %vm498_vm13, %vm499_vm14  ;;  %v513_v36 = vld [vmem:[#allocation2 + $0x8] sm:$0x3] }
  0xfb   :  { %414 = vmatpush.bf16.msra.mxu0 %v327_v37  ;;  %427 = vmatpush.bf16.msra.mxu1 %v330_v39  ;;  %v405_v3 = vsel %vm303_vm1, %v302_v2, 0  ;;  %v322_v45 = vsel %vm314_vm7, %v311_v22, %v99_v42 }
  0xfe   :  { %2036 = vmatmul.msk.bf16.vlgmr.msra.gmra.mxu0 %vm388_vm11, %v381_v28  ;;  %2037 = vmatmul.msk.bf16.vlgmr.msra.gmra.mxu1 %vm388_vm11, %v381_v28 }
  0xff   :  { %464 = vmatpush.bf16.msrb.mxu0 %v405_v3 }
 0x100   :  { %v126_v43 = vpop.permute.xlu0 %125 }
 0x101   :  { %v133_v44 = vsel %vm3565_vm9, %v124_v12, %v126_v43  ;;  %v229_v60 = vpop.permute.xlu1 %228  ;;  %v134_v7 = vsel %vm3565_vm9, %v126_v43, %v128_v61 }
 0x102   :  { %v336_v46 = vsel %vm3566_vm6, %v322_v45, %v133_v44  ;;  %v235_v5 = vsel %vm3562_vm4, %v2290_v17, %v229_v60  ;;  %vm501_vm4 = vmor %vm500_vm0, %vm2416_vm15  ;;  %vm3582_vm0 = vcmask 1042432  }
 0x103   :  { %453 = vmatpush.bf16.msra.mxu3 %v336_v46 }
 0x106   :  { %2039 = vmatmul.msk.bf16.vlgmr.msra.gmra.mxu3 %vm388_vm11, %v381_v28 }
 0x108   :  { %v195_v48 = vpop.permute.xlu0 %194 }
 0x109   :  { %v201_v50 = vsel %vm3563_vm3, %v2288_v0, %v195_v48  ;;  %v94_v56 = vpop.permute.xlu1 %93 }
 0x10a   :  { %v355_v51 = vsel %vm303_vm1, %v167_v49, %v201_v50  ;;  %v100_v0 = vsel %vm3578_vm10, %v2342_v1, %v94_v56 }
 0x10b   :  { %v365_v53 = vsel %vm314_vm7, %v355_v51, %v235_v5 }
 0x10c   :  { %v379_v55 = vsel %vm3566_vm6, %v365_v53, %v269_v52 }
 0x10d   :  { %465 = vmatpush.bf16.msrb.mxu0 %v379_v55 }
 0x110   :  { %v60_v62 = vpop.permute.xlu0 %59 }
 0x111   :  { %v66_v58 = vsel %vm61_vm8, %v2292_v18, %v60_v62 }
 0x112   :  { %v313_v17 = vsel %vm303_vm1, %v2161_v6, %v66_v58 }
 0x113   :  { %v324_v20 = vsel %vm314_vm7, %v313_v17, %v100_v0 }
 0x114   :  { %v339_v9 = vsel %vm3566_vm6, %v324_v20, %v134_v7  ;;  %vm508_vm6 = vmand %vm506_vm2, %vm507_vm12  ;;  %vm3585_vm2 = vcmask 1044480  }
 0x115   :  { %466 = vmatpush.bf16.msrb.mxu0 %v339_v9 }
 0x118   :  { %2040 = vmatmul.msk.bf16.vlgmr.msrb.gmra.mxu0 %vm388_vm11, %v381_v28  ;;  %vm485_vm11 = vcmask 1045508  }
 0x119   :  { %vm504_vm3 = vmand %vm485_vm11, %vm503_vm5 }
 0x11a   :  { %vm505_vm9 = vmor %vm504_vm3, %vm501_vm4  ;;  %vm1266_vm3 = vsmask.f32 4352  ;;  %vm3577_vm4 = vcmask 1022976  }
 0x11b   :  { %vm509_vm13 = vmor %vm508_vm6, %vm505_vm9  ;;  %vm708_vm9 = vcmask 1014784  }
 0x11c   :  { %vm2762_vm6 = vmand %vm3585_vm2, %vm1266_vm3 }
 0x150   :  { %v386_v18 = vpop.permute.xlu0 %385 }
 0x17a   :  { %v442_v8 = vpop.f32.mrf.mxu2 }
 0x17b   :  { %v416_v10 = vpop.f32.mrf.mxu0  ;;  %v429_v13 = vpop.f32.mrf.mxu1  ;;  %v443_v12 = vadd.f32 %v442_v8, %v386_v18 }
 0x17c   :  { %v417_v1 = vadd.f32 %v416_v10, %v386_v18  ;;  %v430_v11 = vadd.f32 %v429_v13, %v386_v18 }
 0x17e   :  { %v472_v16 = vpack.c.bf16 %v430_v11, %v417_v1 }
 0x180   :  { %v478_v23 = vrot.slane %v472_v16, 2 }
 0x182   :  { %v444_v14 = vpop.f32.mrf.mxu2  ;;  %v484_v28 = vsel %vm303_vm1, %v472_v16, %v478_v23 }
 0x183   :  { %v418_v15 = vpop.f32.mrf.mxu0  ;;  %v431_v63 = vpop.f32.mrf.mxu1 }
 0x189   :  { %v455_v19 = vpop.f32.mrf.mxu3 }
 0x18a   :  { %v456_v21 = vadd.f32 %v455_v19, %v386_v18 }
 0x18c   :  { %v473_v24 = vpack.c.bf16 %v456_v21, %v443_v12 }
 0x18e   :  { %v479_v25 = vrot.slane %v473_v24, 4  ;;  %v480_v26 = vrot.slane %v473_v24, 6 }
 0x190   :  { %v488_v29 = vsel %vm485_vm11, %v479_v25, %v480_v26  ;;  %vm1288_vm11 = vcmask 1047552  }
 0x191   :  { %v489_v4 = vsel %vm314_vm7, %v484_v28, %v488_v29  ;;  %v457_v30 = vpop.f32.mrf.mxu3  ;;  %vm2837_vm3 = vmand %vm1288_vm11, %vm507_vm12  ;;  %vm3607_vm11 = vcmask 916480  }
 0x192   :  { %v2429_v31 = vsel %vm509_vm13, %v489_v4, %v510_v27  ;;  %vm3601_vm13 = vcmask 1045504  }
 0x193   :  { %512 = vst [vmem:[#allocation2] sm:$0xff] %v2429_v31  ;;  %vm3605_vm12 = vmmov %vm3601_vm13 }
 0x194   :  { %519 = vst [vmem:[#allocation1] ss:$4 sm:$0xff] %v2429_v31 }
 0x195   :  { %v468_v32 = vpop.f32.mrf.mxu0 }
 0x196   :  { %v469_v33 = vadd.f32 %v468_v32, %v386_v18 }
 0x198   :  { %v474_v34 = vpack.c.bf16 %v469_v33, %v469_v33 }
 0x19a   :  { %v481_v35 = vrot.slane %v474_v34, 2 }
 0x19b   :  { %v2433_v57 = vld.sshfl [vmem:[#allocation1] sm:$0xff pattern:$0x73625140]  ;;  %v2435_v38 = vld.sshfl [vmem:[#allocation1 + $0x8] sm:$0xff pattern:$0x73625140] }
 0x19c   :  { %v2437_v54 = vld.sshfl [vmem:[#allocation1 + $0x10] sm:$0xff pattern:$0x73625140]  ;;  %v2439_v59 = vld.sshfl [vmem:[#allocation1 + $0x18] sm:$0xff pattern:$0x73625140]  ;;  %v492_v37 = vsel %vm303_vm1, %v474_v34, %v481_v35 }
 0x19d   :  { %528 = vst [vmem:[#allocation1] ss:$4 sm:$0xff] %v2429_v31  ;;  %v514_v39 = vsel %vm2416_vm15, %v492_v37, %v513_v36  ;;  %v470_v2 = vpop.f32.mrf.mxu0 }
 0x19e   :  { %515 = vst [vmem:[#allocation2 + $0x8] sm:$0x3] %v514_v39 }
 0x1a4   :  { %v532_v3 = vld.sshfl [vmem:[#allocation1] sm:$0xff pattern:$0x73625140]  ;;  %v533_v40 = vld.sshfl [vmem:[#allocation1 + $0x8] sm:$0xff pattern:$0x73625140] }
 0x1a5   :  { %v534_v41 = vld.sshfl [vmem:[#allocation1 + $0x10] sm:$0xff pattern:$0x73625140]  ;;  %v535_v42 = vld.sshfl [vmem:[#allocation1 + $0x18] sm:$0xff pattern:$0x73625140] }
 0x1a6   :  { %590 = vst [vmem:[#allocation1] ss:$4 sm:$0xff] %v2429_v31  ;;  %v2446_v43 = vld [vmem:[#allocation2 + $0x8] sm:$0x3]  ;;  %v544_v22 = vshrl.u32 %v533_v40, 16  ;;  %v547_v44 = vshll.u32 %v533_v40, 16 }
 0x1a7   :  { %531 = vst [vmem:[#allocation1 + $0x20] ss:$4 sm:$0xff] %v2446_v43  ;;  %v537_v45 = vshrl.u32 %v532_v3, 16  ;;  %v540_v46 = vshll.u32 %v532_v3, 16  ;;  %v558_v60 = vshrl.u32 %v535_v42, 16  ;;  %v561_v49 = vshll.u32 %v535_v42, 16 }
 0x1a8   :  { %v546_v47 = vrot.slane %v544_v22, 6  ;;  %v549_v48 = vrot.slane %v547_v44, 7  ;;  %v551_v50 = vshrl.u32 %v534_v41, 16  ;;  %v554_v55 = vshll.u32 %v534_v41, 16 }
 0x1a9   :  { %v539_v5 = vrot.slane %v537_v45, 6  ;;  %v542_v51 = vrot.slane %v540_v46, 7  ;;  %v560_v56 = vrot.slane %v558_v60, 6  ;;  %v563_v61 = vrot.slane %v561_v49, 7 }
 0x1aa   :  { %v550_v52 = vor.u32 %v549_v48, %v546_v47  ;;  %v553_v62 = vrot.slane %v551_v50, 6  ;;  %v556_v9 = vrot.slane %v554_v55, 7 }
 0x1ab   :  { %v543_v53 = vor.u32 %v542_v51, %v539_v5  ;;  %v564_v14 = vor.u32 %v563_v61, %v560_v56 }
 0x1ac   :  { %574 = vrot.lane.b32.xlu2 %v550_v52, %s2091_s0  ;;  %v557_v15 = vor.u32 %v556_v9, %v553_v62 }
 0x1ad   :  { %v593_v58 = vld.sshfl [vmem:[#allocation1] sm:$0xff pattern:$0x73625140]  ;;  %v595_v0 = vld.sshfl [vmem:[#allocation1 + $0x8] sm:$0xff pattern:$0x73625140]  ;;  %572 = vrot.lane.b32.xlu1 %v543_v53, %s2091_s0 }
 0x1ae   :  { %v597_v17 = vld.sshfl [vmem:[#allocation1 + $0x10] sm:$0xff pattern:$0x73625140]  ;;  %v599_v7 = vld.sshfl [vmem:[#allocation1 + $0x18] sm:$0xff pattern:$0x73625140] }
 0x1af   :  { %622 = vst [vmem:[#allocation1] ss:$4 sm:$0xff] %v2429_v31  ;;  %v536_v20 = vld.sshfl [vmem:[#allocation1 + $0x20] sm:$0xff pattern:$0x73625140]  ;;  %v604_v21 = vrot.slane %v595_v0, 5 }
 0x1b0   :  { %v565_v8 = vshrl.u32 %v536_v20, 16  ;;  %v568_v10 = vshll.u32 %v536_v20, 16  ;;  %592 = vst [vmem:[#allocation1 + $0x20] ss:$4 sm:$0xff] %v2446_v43  ;;  %v603_v25 = vrot.slane %v593_v58, 5  ;;  %v605_v26 = vrot.slane %v597_v17, 5 }
 0x1b1   :  { %v606_v35 = vrot.slane %v599_v7, 5 }
 0x1b2   :  { %v567_v13 = vrot.slane %v565_v8, 6  ;;  %v570_v18 = vrot.slane %v568_v10, 7 }
 0x1b4   :  { %v571_v63 = vor.u32 %v570_v18, %v567_v13  ;;  %578 = vrot.lane.b32.xlu2 %v564_v14, %s2091_s0 }
 0x1b5   :  { %576 = vrot.lane.b32.xlu1 %v557_v15, %s2091_s0 }
 0x1b6   :  { %v625_v1 = vld.sshfl [vmem:[#allocation1] sm:$0xff pattern:$0x73625140]  ;;  %v626_v11 = vld.sshfl [vmem:[#allocation1 + $0x8] sm:$0xff pattern:$0x73625140]  ;;  %580 = vrot.lane.b32.xlu0 %v571_v63, %s2091_s0 }
 0x1b7   :  { %v627_v16 = vld.sshfl [vmem:[#allocation1 + $0x10] sm:$0xff pattern:$0x73625140]  ;;  %v628_v12 = vld.sshfl [vmem:[#allocation1 + $0x18] sm:$0xff pattern:$0x73625140] }
 0x1b8   :  { %685 = vst [vmem:[#allocation1 + $0x3] ss:$4 sm:$0xff] %v2429_v31  ;;  %v601_v19 = vld.sshfl [vmem:[#allocation1 + $0x20] sm:$0xff pattern:$0x73625140]  ;;  %v630_v23 = vshrl.u32 %v625_v1, 16 }
 0x1b9   :  { %v633_v24 = vshll.u32 %v625_v1, 16  ;;  %624 = vst [vmem:[#allocation1 + $0x20] ss:$4 sm:$0xff] %v2446_v43  ;;  %v607_v34 = vrot.slane %v601_v19, 5  ;;  %v644_v36 = vshrl.u32 %v627_v16, 16  ;;  %v647_v37 = vshll.u32 %v627_v16, 16 }
 0x1ba   :  { %v632_v27 = vrot.slane %v630_v23, 3  ;;  %v651_v39 = vshrl.u32 %v628_v12, 16  ;;  %v654_v2 = vshll.u32 %v628_v12, 16  ;;  %v637_v3 = vshrl.u32 %v626_v11, 16 }
 0x1bb   :  { %v635_v28 = vrot.slane %v633_v24, 4  ;;  %v640_v40 = vshll.u32 %v626_v11, 16  ;;  %v646_v42 = vrot.slane %v644_v36, 3  ;;  %v649_v22 = vrot.slane %v647_v37, 4 }
 0x1bc   :  { %610 = vrot.lane.b32.xlu2 %v604_v21, %s2097_s27  ;;  %v653_v44 = vrot.slane %v651_v39, 3  ;;  %v656_v45 = vrot.slane %v654_v2, 4  ;;  %v639_v46 = vrot.slane %v637_v3, 3 }
 0x1bd   :  { %608 = vrot.lane.b32.xlu1 %v603_v25, %s2097_s27  ;;  %v636_v41 = vor.u32 %v635_v28, %v632_v27  ;;  %v642_v60 = vrot.slane %v640_v40, 4  ;;  %v650_v5 = vor.u32 %v649_v22, %v646_v42 }
 0x1be   :  { %612 = vrot.lane.b32.xlu0 %v605_v26, %s2097_s27  ;;  %v657_v56 = vor.u32 %v656_v45, %v653_v44 }
 0x1bf   :  { %v688_v29 = vld.sshfl [vmem:[#allocation1] sm:$0xff pattern:$0x73625140]  ;;  %v690_v4 = vld.sshfl [vmem:[#allocation1 + $0x8] sm:$0xff pattern:$0x73625140]  ;;  %v643_v52 = vor.u32 %v642_v60, %v639_v46 }
 0x1c0   :  { %v692_v30 = vld.sshfl [vmem:[#allocation1 + $0x10] sm:$0xff pattern:$0x73625140]  ;;  %v694_v32 = vld.sshfl [vmem:[#allocation1 + $0x18] sm:$0xff pattern:$0x73625140] }
 0x1c1   :  { %713 = vst [vmem:[#allocation1] ss:$4 sm:$0xff] %v2429_v31  ;;  %v629_v33 = vld.sshfl [vmem:[#allocation1 + $0x20] sm:$0xff pattern:$0x73625140] }
 0x1c2   :  { %687 = vst [vmem:[#allocation1 + $0x23] ss:$4 sm:$0xff] %v2446_v43  ;;  %v658_v53 = vshrl.u32 %v629_v33, 16  ;;  %v661_v55 = vshll.u32 %v629_v33, 16 }
 0x1c4   :  { %616 = vrot.lane.b32.xlu2 %v607_v34, %s2097_s27  ;;  %v660_v61 = vrot.slane %v658_v53, 3  ;;  %v663_v62 = vrot.slane %v661_v55, 4 }
 0x1c5   :  { %614 = vrot.lane.b32.xlu1 %v606_v35, %s2097_s27 }
 0x1c6   :  { %665 = vrot.lane.b32.xlu0 %v636_v41, %s2100_s1  ;;  %v664_v20 = vor.u32 %v663_v62, %v660_v61 }
 0x1c8   :  { %v2466_v47 = vld.sshfl [vmem:[#allocation1] sm:$0xff pattern:$0x73625140]  ;;  %v2468_v48 = vld.sshfl [vmem:[#allocation1 + $0x8] sm:$0xff pattern:$0x73625140] }
 0x1c9   :  { %v718_v49 = vld.sshfl [vmem:[#allocation1 + $0x10] sm:$0xff pattern:$0x73625140]  ;;  %v2470_v50 = vld.sshfl [vmem:[#allocation1 + $0x18] sm:$0xff pattern:$0x73625140] }
 0x1ca   :  { %783 = vst [vmem:[#allocation1] ss:$4 sm:$0xff] %v2429_v31  ;;  %v696_v51 = vld.sshfl [vmem:[#allocation1 + $0x20] sm:$0xff pattern:$0x73625140]  ;;  %v727_v8 = vshll.u32 %v718_v49, 16 }
 0x1cb   :  { %715 = vst [vmem:[#allocation1 + $0x20] ss:$4 sm:$0xff] %v2446_v43  ;;  %v730_v10 = vshll.u32 %v2470_v50, 16  ;;  %v721_v13 = vshll.u32 %v2466_v47, 16  ;;  %v724_v18 = vshll.u32 %v2468_v48, 16  ;;  %v742_v23 = vshrl.u32 %v718_v49, 16 }
 0x1cc   :  { %669 = vrot.lane.b32.xlu2 %v650_v5, %s2100_s1  ;;  %v729_v16 = vrot.slane %v727_v8, 1  ;;  %v736_v33 = vshrl.u32 %v2466_v47, 16  ;;  %v745_v44 = vshrl.u32 %v2470_v50, 16 }
 0x1cd   :  { %667 = vrot.lane.b32.xlu1 %v643_v52, %s2100_s1  ;;  %v732_v12 = vrot.slane %v730_v10, 1  ;;  %v723_v19 = vrot.slane %v721_v13, 1  ;;  %v726_v21 = vrot.slane %v724_v18, 1 }
 0x1ce   :  { %671 = vrot.lane.b32.xlu0 %v657_v56, %s2100_s1 }
 0x1cf   :  { %v2070_v24 = vpack.i.bf16 %v732_v12, %v729_v16  ;;  %v2065_v27 = vpack.i.bf16 %v726_v21, %v723_v19  ;;  %v738_v37 = vor.u32 %v736_v33, %v723_v19  ;;  %v747_v46 = vor.u32 %v745_v44, %v732_v12 }
 0x1d1   :  { %v786_v58 = vld.sshfl [vmem:[#allocation1] sm:$0xff pattern:$0x73625140]  ;;  %v2477_v0 = vld.sshfl [vmem:[#allocation1 + $0x8] sm:$0xff pattern:$0x73625140] }
 0x1d2   :  { %v2479_v17 = vld.sshfl [vmem:[#allocation1 + $0x10] sm:$0xff pattern:$0x73625140]  ;;  %v2481_v7 = vld.sshfl [vmem:[#allocation1 + $0x18] sm:$0xff pattern:$0x73625140] }
 0x1d3   :  { %815 = vst [vmem:[#allocation1] ss:$4 sm:$0xff] %v2429_v31  ;;  %v720_v9 = vld.sshfl [vmem:[#allocation1 + $0x20] sm:$0xff pattern:$0x73625140]  ;;  %v796_v36 = vrot.slane %v786_v58, 7 }
 0x1d4   :  { %698 = vrot.lane.b32.xlu2 %v688_v29, %s2101_s2  ;;  %785 = vst [vmem:[#allocation1 + $0x20] ss:$4 sm:$0xff] %v2446_v43  ;;  %v733_v35 = vshll.u32 %v720_v9, 16  ;;  %v748_v22 = vshrl.u32 %v720_v9, 16  ;;  %v799_v60 = vrot.slane %v2481_v7, 7  ;;  %v798_v58 = vrot.slane %v2479_v17, 7 }
 0x1d5   :  { %673 = vrot.lane.b32.xlu1 %v664_v20, %s2100_s1  ;;  %v797_v7 = vrot.slane %v2477_v0, 7 }
 0x1d6   :  { %700 = vrot.lane.b32.xlu0 %v690_v4, %s2101_s2  ;;  %v744_v4 = vor.u32 %v742_v23, %v729_v16  ;;  %v2526_v41 = vrot.slane %v733_v35, 1 }
 0x1d8   :  { %v750_v45 = vor.u32 %v748_v22, %v2526_v41 }
 0x1da   :  { %v2489_v14 = vld.sshfl [vmem:[#allocation1] sm:$0xff pattern:$0x73625140]  ;;  %v819_v15 = vld.sshfl [vmem:[#allocation1 + $0x8] sm:$0xff pattern:$0x73625140] }
 0x1db   :  { %v2491_v63 = vld.sshfl [vmem:[#allocation1 + $0x10] sm:$0xff pattern:$0x73625140]  ;;  %v2493_v1 = vld.sshfl [vmem:[#allocation1 + $0x18] sm:$0xff pattern:$0x73625140] }
 0x1dc   :  { %877 = vst [vmem:[#allocation1 + $0x2] ss:$4 sm:$0xff] %v2429_v31  ;;  %704 = vrot.lane.b32.xlu2 %v694_v32, %s2101_s2  ;;  %v2496_v11 = vld.sshfl [vmem:[#allocation1 + $0x20] sm:$0xff pattern:$0x73625140]  ;;  %v739_v32 = vshrl.u32 %v2468_v48, 16 }
 0x1dd   :  { %702 = vrot.lane.b32.xlu1 %v692_v30, %s2101_s2  ;;  %817 = vst [vmem:[#allocation1 + $0x20] ss:$4 sm:$0xff] %v2446_v43  ;;  %v830_v47 = vshrl.u32 %v819_v15, 16  ;;  %v833_v48 = vshll.u32 %v819_v15, 16  ;;  %v823_v61 = vshrl.u32 %v2489_v14, 16  ;;  %v826_v62 = vshll.u32 %v2489_v14, 16 }
 0x1de   :  { %706 = vrot.lane.b32.xlu0 %v696_v51, %s2101_s2  ;;  %v741_v34 = vor.u32 %v739_v32, %v726_v21  ;;  %v844_v12 = vshrl.u32 %v2493_v1, 16  ;;  %v847_v21 = vshll.u32 %v2493_v1, 16  ;;  %v837_v23 = vshrl.u32 %v2491_v63, 16 }
 0x1df   :  { %v832_v53 = vrot.slane %v830_v47, 5  ;;  %v835_v55 = vrot.slane %v833_v48, 6  ;;  %v825_v10 = vrot.slane %v823_v61, 5  ;;  %v828_v13 = vrot.slane %v826_v62, 6 }
 0x1e0   :  { %v846_v32 = vrot.slane %v844_v12, 5  ;;  %v849_v33 = vrot.slane %v847_v21, 6 }
 0x1e1   :  { %v836_v20 = vor.u32 %v835_v55, %v832_v53  ;;  %v829_v19 = vor.u32 %v828_v13, %v825_v10 }
 0x1e2   :  { %v850_v22 = vor.u32 %v849_v33, %v846_v32 }
 0x1e3   :  { %v2499_v25 = vld.sshfl [vmem:[#allocation1] sm:$0xff pattern:$0x73625140]  ;;  %v2501_v26 = vld.sshfl [vmem:[#allocation1 + $0x8] sm:$0xff pattern:$0x73625140] }
 0x1e4   :  { %v2503_v28 = vld.sshfl [vmem:[#allocation1 + $0x10] sm:$0xff pattern:$0x73625140]  ;;  %v2505_v29 = vld.sshfl [vmem:[#allocation1 + $0x18] sm:$0xff pattern:$0x73625140]  ;;  %2071 = vrot.lane.b32.xlu2 %v2070_v24, %s2098_s28 }
 0x1e5   :  { %905 = vst [vmem:[#allocation1] ss:$4 sm:$0xff] %v2429_v31  ;;  %2066 = vrot.lane.b32.xlu1 %v2065_v27, %s2098_s28  ;;  %v822_v30 = vld.sshfl [vmem:[#allocation1 + $0x20] sm:$0xff pattern:$0x73625140]  ;;  %v840_v24 = vshll.u32 %v2491_v63, 16 }
 0x1e6   :  { %765 = vrot.lane.b32.xlu0 %v744_v4, %s2098_s28  ;;  %879 = vst [vmem:[#allocation1 + $0x22] ss:$4 sm:$0xff] %v2446_v43  ;;  %v851_v56 = vshrl.u32 %v822_v30, 16  ;;  %v854_v9 = vshll.u32 %v822_v30, 16  ;;  %v800_v27 = vrot.slane %v2496_v11, 7 }
 0x1e7   :  { %v842_v35 = vrot.slane %v840_v24, 6 }
 0x1e8   :  { %v853_v8 = vrot.slane %v851_v56, 5  ;;  %v856_v0 = vrot.slane %v854_v9, 6 }
 0x1ea   :  { %v857_v4 = vor.u32 %v856_v0, %v853_v8 }
 0x1ec   :  { %v2514_v39 = vld.sshfl [vmem:[#allocation1] sm:$0xff pattern:$0x73625140]  ;;  %v2516_v2 = vld.sshfl [vmem:[#allocation1 + $0x8] sm:$0xff pattern:$0x73625140]  ;;  %763 = vrot.lane.b32.xlu2 %v741_v34, %s2098_s28 }
 0x1ed   :  { %v2519_v3 = vld.sshfl [vmem:[#allocation1 + $0x10] sm:$0xff pattern:$0x73625140]  ;;  %v2521_v40 = vld.sshfl [vmem:[#allocation1 + $0x18] sm:$0xff pattern:$0x73625140]  ;;  %761 = vrot.lane.b32.xlu1 %v738_v37, %s2098_s28 }
 0x1ee   :  { %967 = vst [vmem:[#allocation1] ss:$4 sm:$0xff] %v2429_v31  ;;  %801 = vrot.lane.b32.xlu0 %v796_v36, %s2092_s22  ;;  %v2528_v42 = vld.sshfl [vmem:[#allocation1 + $0x20] sm:$0xff pattern:$0x73625140]  ;;  %v839_v34 = vrot.slane %v837_v23, 5 }
 0x1ef   :  { %907 = vst [vmem:[#allocation1 + $0x20] ss:$4 sm:$0xff] %v2446_v43  ;;  %v927_v8 = vshrl.u32 %v2519_v3, 16  ;;  %v923_v12 = vshll.u32 %v2516_v2, 16 }
 0x1f0   :  { %v843_v44 = vor.u32 %v842_v35, %v839_v34 }
 0x1f1   :  { %v929_v23 = vrot.slane %v927_v8, 2 }
 0x1f4   :  { %769 = vrot.lane.b32.xlu2 %v750_v45, %s2098_s28  ;;  %v913_v45 = vshrl.u32 %v2514_v39, 16 }
 0x1f5   :  { %v2535_v49 = vld.sshfl [vmem:[#allocation1] sm:$0xff pattern:$0x73625140]  ;;  %v2537_v5 = vld.sshfl [vmem:[#allocation1 + $0x8] sm:$0xff pattern:$0x73625140]  ;;  %767 = vrot.lane.b32.xlu1 %v747_v46, %s2098_s28 }
 0x1f6   :  { %v2540_v51 = vld.sshfl [vmem:[#allocation1 + $0x10] sm:$0xff pattern:$0x73625140]  ;;  %v2542_v52 = vld.sshfl [vmem:[#allocation1 + $0x18] sm:$0xff pattern:$0x73625140]  ;;  %807 = vrot.lane.b32.xlu0 %v799_v60, %s2092_s22 }
 0x1f7   :  { %1003 = vst [vmem:[#allocation1] ss:$4 sm:$0xff] %v2429_v31  ;;  %v2546_v50 = vld.sshfl [vmem:[#allocation1 + $0x20] sm:$0xff pattern:$0x73625140]  ;;  %v916_v46 = vshll.u32 %v2514_v39, 16 }
 0x1f8   :  { %969 = vst [vmem:[#allocation1 + $0x20] ss:$4 sm:$0xff] %v2446_v43  ;;  %v915_v47 = vrot.slane %v913_v45, 2  ;;  %v944_v33 = vshll.u32 %v2546_v50, 16 }
 0x1f9   :  { %v918_v48 = vrot.slane %v916_v46, 3  ;;  %v981_v46 = vrot.slane %v2537_v5, 1 }
 0x1fb   :  { %v919_v62 = vor.u32 %v918_v48, %v915_v47 }
 0x1fc   :  { %805 = vrot.lane.b32.xlu2 %v798_v58, %s2092_s22  ;;  %v937_v58 = vshll.u32 %v2521_v40, 16 }
 0x1fd   :  { %803 = vrot.lane.b32.xlu1 %v797_v7, %s2092_s22 }
 0x1fe   :  { %v2555_v18 = vld.sshfl [vmem:[#allocation1] sm:$0xff pattern:$0x73625140]  ;;  %v2557_v15 = vld.sshfl [vmem:[#allocation1 + $0x8] sm:$0xff pattern:$0x73625140]  ;;  %860 = vrot.lane.b32.xlu0 %v836_v20, %s2093_s23 }
 0x1ff   :  { %v2560_v14 = vld.sshfl [vmem:[#allocation1 + $0x10] sm:$0xff pattern:$0x73625140]  ;;  %v2562_v17 = vld.sshfl [vmem:[#allocation1 + $0x18] sm:$0xff pattern:$0x73625140] }
 0x200   :  { %1060 = vst [vmem:[#allocation1 + $0x1] ss:$4 sm:$0xff] %v2429_v31  ;;  %v2565_v16 = vld.sshfl [vmem:[#allocation1 + $0x20] sm:$0xff pattern:$0x73625140]  ;;  %v939_v9 = vrot.slane %v937_v58, 3 }
 0x201   :  { %1005 = vst [vmem:[#allocation1 + $0x20] ss:$4 sm:$0xff] %v2446_v43  ;;  %v984_v8 = vrot.slane %v2565_v16, 1 }
 0x204   :  { %858 = vrot.lane.b32.xlu2 %v829_v19, %s2093_s23 }
 0x205   :  { %809 = vrot.lane.b32.xlu1 %v800_v27, %s2092_s22 }
 0x206   :  { %866 = vrot.lane.b32.xlu0 %v857_v4, %s2093_s23  ;;  %v2576_v30 = vpop.permute.xlu2 %574 }
 0x207   :  { %v2578_v1 = vld.sshfl [vmem:[#allocation1] sm:$0xff pattern:$0x73625140]  ;;  %v2580_v36 = vld.sshfl [vmem:[#allocation1 + $0x8] sm:$0xff pattern:$0x73625140] }
 0x208   :  { %v2582_v63 = vld.sshfl [vmem:[#allocation1 + $0x10] sm:$0xff pattern:$0x73625140]  ;;  %v2584_v11 = vld.sshfl [vmem:[#allocation1 + $0x18] sm:$0xff pattern:$0x73625140] }
 0x209   :  { %1087 = vst [vmem:[#allocation1] ss:$4 sm:$0xff] %v2429_v31  ;;  %v2587_v37 = vld.sshfl [vmem:[#allocation1 + $0x20] sm:$0xff pattern:$0x73625140] }
 0x20a   :  { %1062 = vst [vmem:[#allocation1 + $0x21] ss:$4 sm:$0xff] %v2446_v43 }
 0x20c   :  { %864 = vrot.lane.b32.xlu2 %v850_v22, %s2093_s23 }
 0x20d   :  { %862 = vrot.lane.b32.xlu1 %v843_v44, %s2093_s23 }
 0x20e   :  { %894 = vrot.lane.b32.xlu0 %v2503_v28, %s2102_s8  ;;  %v2596_v60 = vpop.permute.xlu2 %578  ;;  %v934_v28 = vshrl.u32 %v2521_v40, 16 }
 0x210   :  { %v2598_v53 = vld.sshfl [vmem:[#allocation1] sm:$0xff pattern:$0x73625140]  ;;  %v2600_v55 = vld.sshfl [vmem:[#allocation1 + $0x8] sm:$0xff pattern:$0x73625140] }
 0x211   :  { %v2602_v56 = vld.sshfl [vmem:[#allocation1 + $0x10] sm:$0xff pattern:$0x73625140]  ;;  %v2604_v61 = vld.sshfl [vmem:[#allocation1 + $0x18] sm:$0xff pattern:$0x73625140] }
 0x212   :  { %1149 = vst [vmem:[#allocation1] ss:$4 sm:$0xff] %v2429_v31  ;;  %v2607_v39 = vld.sshfl [vmem:[#allocation1 + $0x20] sm:$0xff pattern:$0x73625140]  ;;  %v936_v20 = vrot.slane %v934_v28, 2 }
 0x213   :  { %1089 = vst [vmem:[#allocation1 + $0x20] ss:$4 sm:$0xff] %v2446_v43  ;;  %v946_v28 = vrot.slane %v944_v33, 3 }
 0x214   :  { %892 = vrot.lane.b32.xlu2 %v2501_v26, %s2102_s8  ;;  %v930_v26 = vshll.u32 %v2519_v3, 16  ;;  %v940_v19 = vor.u32 %v939_v9, %v936_v20 }
 0x215   :  { %890 = vrot.lane.b32.xlu1 %v2499_v25, %s2102_s8  ;;  %v920_v25 = vshrl.u32 %v2516_v2, 16  ;;  %v925_v2 = vrot.slane %v923_v12, 3 }
 0x216   :  { %948 = vrot.lane.b32.xlu0 %v919_v62, %s2103_s9  ;;  %v2617_v7 = vpop.permute.xlu2 %610  ;;  %v932_v24 = vrot.slane %v930_v26, 3  ;;  %v980_v26 = vrot.slane %v2535_v49, 1 }
 0x217   :  { %v922_v4 = vrot.slane %v920_v25, 2  ;;  %v1023_v25 = vshrl.u32 %v2560_v14, 16 }
 0x218   :  { %v933_v35 = vor.u32 %v932_v24, %v929_v23 }
 0x219   :  { %v2621_v10 = vld.sshfl [vmem:[#allocation1] sm:$0xff pattern:$0x73625140]  ;;  %v2623_v13 = vld.sshfl [vmem:[#allocation1 + $0x8] sm:$0xff pattern:$0x73625140]  ;;  %v926_v45 = vor.u32 %v925_v2, %v922_v4 }
 0x21a   :  { %3589 = vst [vmem:[#allocation3_spill] sm:$0xff] %v2621_v10  ;;  %v2625_v40 = vld.sshfl [vmem:[#allocation1 + $0x10] sm:$0xff pattern:$0x73625140] }
 0x21b   :  { %v2627_v0 = vld.sshfl [vmem:[#allocation1 + $0x18] sm:$0xff pattern:$0x73625140]  ;;  %v2634_v21 = vld.sshfl [vmem:[#allocation1 + $0x20] sm:$0xff pattern:$0x73625140] }
 0x21c   :  { %1182 = vst [vmem:[#allocation1] ss:$4 sm:$0xff] %v2429_v31  ;;  %898 = vrot.lane.b32.xlu2 %v2528_v42, %s2102_s8  ;;  %v941_v42 = vshrl.u32 %v2546_v50, 16 }
 0x21d   :  { %3590 = vst [vmem:[#allocation4_spill] sm:$0xff] %v2634_v21  ;;  %896 = vrot.lane.b32.xlu1 %v2505_v29, %s2102_s8 }
 0x21e   :  { %1151 = vst [vmem:[#allocation1 + $0x20] ss:$4 sm:$0xff] %v2446_v43  ;;  %954 = vrot.lane.b32.xlu0 %v940_v19, %s2103_s9  ;;  %v2640_v3 = vpop.permute.xlu2 %616  ;;  %v943_v62 = vrot.slane %v941_v42, 2  ;;  %v1025_v42 = vrot.slane %v1023_v25, 7 }
 0x21f   :  { %v573_v27 = vpop.permute.xlu1 %572 }
 0x220   :  { %v582_v32 = vsel %vm61_vm8, %v573_v27, %v2576_v30  ;;  %v947_v23 = vor.u32 %v946_v28, %v943_v62  ;;  %v982_v62 = vrot.slane %v2540_v51, 1  ;;  %v1011_v28 = vshrl.u32 %v2555_v18, 16 }
 0x221   :  { %v1244_v27 = vsel %vm2416_vm15, %v2433_v57, %v582_v32  ;;  %v1026_v57 = vshll.u32 %v2560_v14, 16  ;;  %v983_v32 = vrot.slane %v2542_v52, 1 }
 0x222   :  { %v1013_v25 = vrot.slane %v1011_v28, 7 }
 0x223   :  { %v2646_v34 = vld.sshfl [vmem:[#allocation1] sm:$0xff pattern:$0x73625140]  ;;  %v2648_v29 = vld.sshfl [vmem:[#allocation1 + $0x8] sm:$0xff pattern:$0x73625140] }
 0x224   :  { %3591 = vst [vmem:[#allocation5_spill] sm:$0xff] %v2646_v34  ;;  %v2650_v22 = vld.sshfl [vmem:[#allocation1 + $0x10] sm:$0xff pattern:$0x73625140]  ;;  %952 = vrot.lane.b32.xlu2 %v933_v35, %s2103_s9 }
 0x225   :  { %v2652_v44 = vld.sshfl [vmem:[#allocation1 + $0x18] sm:$0xff pattern:$0x73625140]  ;;  %v2657_v47 = vld.sshfl [vmem:[#allocation1 + $0x20] sm:$0xff pattern:$0x73625140]  ;;  %950 = vrot.lane.b32.xlu1 %v926_v45, %s2103_s9 }
 0x226   :  { %1410 = vst [vmem:[#allocation1] ss:$4 sm:$0xff] %v2429_v31  ;;  %987 = vrot.lane.b32.xlu0 %v981_v46, %s2094_s24  ;;  %v2662_v50 = vpop.permute.xlu2 %669 }
 0x227   :  { %3592 = vst [vmem:[#allocation6_spill] sm:$0xff] %v2657_v47  ;;  %v577_v48 = vpop.permute.xlu1 %576 }
 0x228   :  { %1184 = vst [vmem:[#allocation1 + $0x20] ss:$4 sm:$0xff] %v2446_v43  ;;  %v581_v58 = vpop.permute.xlu0 %580  ;;  %v583_v20 = vsel %vm61_vm8, %v2576_v30, %v577_v48  ;;  %v584_v5 = vsel %vm61_vm8, %v577_v48, %v2596_v60  ;;  %v1017_v48 = vshrl.u32 %v2557_v15, 16 }
 0x229   :  { %v585_v9 = vsel %vm61_vm8, %v2596_v60, %v581_v58  ;;  %v1245_v33 = vsel %vm2416_vm15, %v2435_v38, %v583_v20 }
 0x22a   :  { %v1019_v52 = vrot.slane %v1017_v48, 7 }
 0x22c   :  { %985 = vrot.lane.b32.xlu2 %v980_v26, %s2094_s24  ;;  %v1020_v26 = vshll.u32 %v2557_v15, 16 }
 0x22d   :  { %v2673_v12 = vld.sshfl [vmem:[#allocation1] sm:$0xff pattern:$0x73625140]  ;;  %v2675_v19 = vld.sshfl [vmem:[#allocation1 + $0x8] sm:$0xff pattern:$0x73625140]  ;;  %956 = vrot.lane.b32.xlu1 %v947_v23, %s2103_s9 }
 0x22e   :  { %3593 = vst [vmem:[#allocation7_spill] sm:$0xff] %v2675_v19  ;;  %v2677_v24 = vld.sshfl [vmem:[#allocation1 + $0x10] sm:$0xff pattern:$0x73625140]  ;;  %993 = vrot.lane.b32.xlu0 %v984_v8, %s2094_s24  ;;  %v2687_v49 = vpop.permute.xlu2 %698  ;;  %v1029_v23 = vshrl.u32 %v2562_v17, 16 }
 0x22f   :  { %3594 = vst [vmem:[#allocation8_spill] sm:$0xff] %v2677_v24  ;;  %v2679_v30 = vld.sshfl [vmem:[#allocation1 + $0x18] sm:$0xff pattern:$0x73625140]  ;;  %v609_v60 = vpop.permute.xlu1 %608 }
 0x230   :  { %3595 = vst [vmem:[#allocation9_spill] sm:$0xff] %v2679_v30  ;;  %v2684_v16 = vld.sshfl [vmem:[#allocation1 + $0x20] sm:$0xff pattern:$0x73625140]  ;;  %v613_v4 = vpop.permute.xlu0 %612  ;;  %v618_v2 = vsel %vm3578_vm10, %v609_v60, %v2617_v7 }
 0x231   :  { %1423 = vst [vmem:[#allocation1] ss:$4 sm:$0xff] %v2429_v31  ;;  %v619_v35 = vsel %vm3578_vm10, %v2617_v7, %v613_v4  ;;  %v2701_v45 = vsel %vm3582_vm0, %v1244_v27, %v618_v2  ;;  %v1028_v7 = vor.u32 %v1026_v57, %v1025_v42  ;;  %v1247_v27 = vsel %vm2416_vm15, %v2439_v59, %v585_v9 }
 0x232   :  { %3596 = vst [vmem:[#allocation10_spill] sm:$0xff] %v2684_v16  ;;  %v2704_v46 = vsel %vm3582_vm0, %v1245_v33, %v619_v35  ;;  %v1246_v2 = vsel %vm2416_vm15, %v2437_v54, %v584_v5  ;;  %v1014_v59 = vshll.u32 %v2555_v18, 16  ;;  %v1022_v9 = vor.u32 %v1020_v26, %v1019_v52 }
 0x233   :  { %1412 = vst [vmem:[#allocation1 + $0x20] ss:$4 sm:$0xff] %v2446_v43  ;;  %v1032_v5 = vshll.u32 %v2562_v17, 16  ;;  %v3598_v17 = vmov 0  ;;  %v1109_v52 = vshrl.u32 %v2602_v56, 16 }
 0x234   :  { %991 = vrot.lane.b32.xlu2 %v983_v32, %s2094_s24  ;;  %v1016_v54 = vor.u32 %v1014_v59, %v1013_v25  ;;  %v1031_v32 = vrot.slane %v1029_v23, 7  ;;  %v3599_v17 = vsel %vm2762_vm6, 4294967295, %v3598_v17 }
 0x235   :  { %989 = vrot.lane.b32.xlu1 %v982_v62, %s2094_s24  ;;  %3600 = vst [vmem:[#allocation12_spill] sm:$0xff] %v3599_v17 }
 0x236   :  { %1045 = vrot.lane.b32.xlu0 %v1028_v7, %s2095_s25  ;;  %v2723_v51 = vpop.permute.xlu2 %704 }
 0x237   :  { %v615_v14 = vpop.permute.xlu1 %614 }
 0x238   :  { %v2711_v38 = vld.sshfl [vmem:[#allocation1] sm:$0xff pattern:$0x73625140]  ;;  %v2713_v58 = vld.sshfl [vmem:[#allocation1 + $0x8] sm:$0xff pattern:$0x73625140]  ;;  %v666_v42 = vpop.permute.xlu0 %665  ;;  %v620_v33 = vsel %vm3578_vm10, %v613_v4, %v615_v14  ;;  %v621_v35 = vsel %vm3578_vm10, %v615_v14, %v2640_v3 }
 0x239   :  { %v2716_v20 = vld.sshfl [vmem:[#allocation1 + $0x10] sm:$0xff pattern:$0x73625140]  ;;  %v2718_v8 = vld.sshfl [vmem:[#allocation1 + $0x18] sm:$0xff pattern:$0x73625140]  ;;  %v2740_v15 = vsel %vm3582_vm0, %v1246_v2, %v620_v33  ;;  %v2743_v57 = vsel %vm3582_vm0, %v1247_v27, %v621_v35 }
 0x23a   :  { %1485 = vst [vmem:[#allocation1] ss:$4 sm:$0xff] %v2429_v31  ;;  %v2727_v60 = vld.sshfl [vmem:[#allocation1 + $0x20] sm:$0xff pattern:$0x73625140]  ;;  %v1116_v3 = vshrl.u32 %v2604_v61, 16 }
 0x23b   :  { %3597 = vst [vmem:[#allocation11_spill] sm:$0xff] %v2727_v60  ;;  %v1119_v4 = vshll.u32 %v2604_v61, 16  ;;  %v1112_v35 = vshll.u32 %v2602_v56, 16  ;;  %v1455_v34 = vshll.u32 %v2718_v8, 16  ;;  %vm3623_vm10 = vcmask 900096  }
 0x23c   :  { %1425 = vst [vmem:[#allocation1 + $0x20] ss:$4 sm:$0xff] %v2446_v43  ;;  %1043 = vrot.lane.b32.xlu2 %v1022_v9, %s2095_s25  ;;  %v1118_v23 = vrot.slane %v1116_v3, 4  ;;  %v1034_v9 = vor.u32 %v1032_v5, %v1031_v32 }
 0x23d   :  { %1041 = vrot.lane.b32.xlu1 %v1016_v54, %s2095_s25  ;;  %v1121_v27 = vrot.slane %v1119_v4, 5  ;;  %v1457_v16 = vrot.slane %v1455_v34, 7 }
 0x23e   :  { %1077 = vrot.lane.b32.xlu0 %v2582_v63, %s2096_s26  ;;  %v2766_v61 = vpop.permute.xlu2 %2071 }
 0x23f   :  { %v668_v7 = vpop.permute.xlu1 %667  ;;  %v1122_v54 = vor.u32 %v1121_v27, %v1118_v23  ;;  %v1438_v27 = vshrl.u32 %v2713_v58, 16 }
 0x240   :  { %v672_v26 = vpop.permute.xlu0 %671  ;;  %v676_v25 = vsel %vm3577_vm4, %v666_v42, %v668_v7  ;;  %v2775_v63 = vsel %vm3577_vm4, %v668_v7, %v2662_v50 }
 0x241   :  { %v2750_v48 = vld.sshfl [vmem:[#allocation1] sm:$0xff pattern:$0x73625140]  ;;  %v2752_v62 = vld.sshfl [vmem:[#allocation1 + $0x8] sm:$0xff pattern:$0x73625140]  ;;  %v2780_v2 = vsel %vm3577_vm4, %v2662_v50, %v672_v26  ;;  %v1268_v33 = vsel %vm2762_vm6, %v2701_v45, %v676_v25  ;;  %v1269_v42 = vsel %vm2762_vm6, %v2704_v46, %v2775_v63 }
 0x242   :  { %v2755_v18 = vld.sshfl [vmem:[#allocation1 + $0x10] sm:$0xff pattern:$0x73625140]  ;;  %v2757_v28 = vld.sshfl [vmem:[#allocation1 + $0x18] sm:$0xff pattern:$0x73625140]  ;;  %v1270_v59 = vsel %vm2762_vm6, %v2740_v15, %v2780_v2 }
 0x243   :  { %1517 = vst [vmem:[#allocation1] ss:$4 sm:$0xff] %v2429_v31  ;;  %v2770_v14 = vld.sshfl [vmem:[#allocation1 + $0x20] sm:$0xff pattern:$0x73625140]  ;;  %v1111_v50 = vrot.slane %v1109_v52, 4 }
 0x244   :  { %1487 = vst [vmem:[#allocation1 + $0x20] ss:$4 sm:$0xff] %v2446_v43  ;;  %1075 = vrot.lane.b32.xlu2 %v2580_v36, %s2096_s26  ;;  %v1114_v45 = vrot.slane %v1112_v35, 5  ;;  %v1102_v63 = vshrl.u32 %v2600_v55, 16  ;;  %v1441_v2 = vshll.u32 %v2713_v58, 16  ;;  %v1165_v35 = vrot.slane %v2627_v0, 3 }
 0x245   :  { %1047 = vrot.lane.b32.xlu1 %v1034_v9, %s2095_s25  ;;  %v1440_v58 = vrot.slane %v1438_v27, 6  ;;  %v1498_v10 = vrot.slane %v2750_v48, 5 }
 0x246   :  { %1136 = vrot.lane.b32.xlu0 %v1122_v54, %s2104_s10  ;;  %v2802_v56 = vpop.permute.xlu2 %763  ;;  %v1115_v23 = vor.u32 %v1114_v45, %v1111_v50  ;;  %v1104_v9 = vrot.slane %v1102_v63, 4  ;;  %v1443_v0 = vrot.slane %v1441_v2, 7  ;;  %v1164_v50 = vrot.slane %v2625_v40, 3 }
 0x247   :  { %v674_v4 = vpop.permute.xlu1 %673 }
 0x248   :  { %v701_v36 = vpop.permute.xlu0 %700  ;;  %v679_v32 = vsel %vm3577_vm4, %v672_v26, %v674_v4  ;;  %v1105_v26 = vshll.u32 %v2600_v55, 16 }
 0x249   :  { %v709_v52 = vsel %vm708_vm9, %v2687_v49, %v701_v36  ;;  %v1271_v25 = vsel %vm2762_vm6, %v2743_v57, %v679_v32  ;;  %v3568_v49 = vunpack.i.h.bf16 %v2766_v61  ;;  %v2073_v57 = vunpack.i.l.bf16 %v2766_v61 }
 0x24a   :  { %v2797_v3 = vld.sshfl [vmem:[#allocation1] sm:$0xff pattern:$0x73625140]  ;;  %v2799_v46 = vld.sshfl [vmem:[#allocation1 + $0x8] sm:$0xff pattern:$0x73625140]  ;;  %v2829_v54 = vsel %vm3601_vm13, %v1268_v33, %v709_v52  ;;  %vm3609_vm13 = vmmov %vm3605_vm12 }
 0x24b   :  { %v2804_v15 = vld.sshfl [vmem:[#allocation1 + $0x10] sm:$0xff pattern:$0x73625140]  ;;  %v2806_v5 = vld.sshfl [vmem:[#allocation1 + $0x18] sm:$0xff pattern:$0x73625140]  ;;  %v2863_v47 = vsel %vm3607_vm11, %v2073_v57, %v3568_v49 }
 0x24c   :  { %1580 = vst [vmem:[#allocation1 + $0x3] ss:$4 sm:$0xff] %v2429_v31  ;;  %v2810_v7 = vld.sshfl [vmem:[#allocation1 + $0x20] sm:$0xff pattern:$0x73625140]  ;;  %1134 = vrot.lane.b32.xlu2 %v1115_v23, %s2104_s10  ;;  %v1107_v45 = vrot.slane %v1105_v26, 5 }
 0x24d   :  { %1519 = vst [vmem:[#allocation1 + $0x20] ss:$4 sm:$0xff] %v2446_v43  ;;  %1079 = vrot.lane.b32.xlu1 %v2584_v11, %s2096_s26  ;;  %v1528_v60 = vshll.u32 %v2797_v3, 16 }
 0x24e   :  { %3602 = vst [vmem:[#allocation13_spill] sm:$0xff] %v2829_v54  ;;  %1173 = vrot.lane.b32.xlu0 %v1165_v35, %s2105_s11  ;;  %v2832_v55 = vpop.permute.xlu2 %769 }
 0x24f   :  { %v703_v32 = vpop.permute.xlu1 %702  ;;  %3608 = vst [vmem:[#allocation15_spill] sm:$0xff] %v2863_v47 }
 0x250   :  { %v707_v23 = vpop.permute.xlu0 %706  ;;  %v710_v27 = vsel %vm708_vm9, %v701_v36, %v703_v32  ;;  %v711_v40 = vsel %vm708_vm9, %v703_v32, %v2723_v51  ;;  %v1452_v32 = vshrl.u32 %v2718_v8, 16 }
 0x251   :  { %v712_v2 = vsel %vm708_vm9, %v2723_v51, %v707_v23  ;;  %v2858_v35 = vsel %vm3605_vm12, %v1269_v42, %v710_v27  ;;  %v2866_v36 = vsel %vm3609_vm13, %v1270_v59, %v711_v40  ;;  %vm3611_vm9 = vmmov %vm3605_vm12  ;;  %v1108_v23 = vor.u32 %v1107_v45, %v1104_v9 }
 0x252   :  { %3606 = vst [vmem:[#allocation14_spill] sm:$0xff] %v2858_v35  ;;  %v2876_v42 = vsel %vm3611_vm9, %v1271_v25, %v712_v2  ;;  %v1459_v27 = vshrl.u32 %v2770_v14, 16  ;;  %v1462_v59 = vshll.u32 %v2770_v14, 16  ;;  %v1444_v40 = vor.u32 %v1443_v0, %v1440_v58  ;;  %vm3612_vm12 = vmmov %vm3607_vm11 }
 0x253   :  { %v2841_v11 = vld.sshfl [vmem:[#allocation1] sm:$0xff pattern:$0x73625140]  ;;  %v2843_v33 = vld.sshfl [vmem:[#allocation1 + $0x8] sm:$0xff pattern:$0x73625140]  ;;  %vm3614_vm13 = vmmov %vm3607_vm11 }
 0x254   :  { %v2845_v52 = vld.sshfl [vmem:[#allocation1 + $0x10] sm:$0xff pattern:$0x73625140]  ;;  %v2847_v63 = vld.sshfl [vmem:[#allocation1 + $0x18] sm:$0xff pattern:$0x73625140]  ;;  %1171 = vrot.lane.b32.xlu2 %v1164_v50, %s2105_s11  ;;  %vm3616_vm9 = vmmov %vm3607_vm11 }
 0x255   :  { %1608 = vst [vmem:[#allocation1] ss:$4 sm:$0xff] %v2429_v31  ;;  %v2855_v26 = vld.sshfl [vmem:[#allocation1 + $0x20] sm:$0xff pattern:$0x73625140]  ;;  %1132 = vrot.lane.b32.xlu1 %v1108_v23, %s2104_s10  ;;  %v1454_v49 = vrot.slane %v1452_v32, 6 }
 0x256   :  { %3610 = vst [vmem:[#allocation16_spill] sm:$0xff] %v2866_v36  ;;  %1468 = vrot.lane.b32.xlu0 %v1444_v40, %s2091_s0  ;;  %v2883_v8 = vpop.permute.xlu2 %805  ;;  %v1461_v47 = vrot.slane %v1459_v27, 6  ;;  %v1464_v25 = vrot.slane %v1462_v59, 7  ;;  %v1163_v32 = vrot.slane %v2623_v13, 3  ;;  %v1445_v27 = vshrl.u32 %v2716_v20, 16 }
 0x257   :  { %1582 = vst [vmem:[#allocation1 + $0x23] ss:$4 sm:$0xff] %v2446_v43  ;;  %v2067_v51 = vpop.permute.xlu1 %2066  ;;  %v1458_v34 = vor.u32 %v1457_v16, %v1454_v49  ;;  %v1448_v59 = vshll.u32 %v2716_v20, 16  ;;  %v1553_v17 = vshrl.u32 %v2855_v26, 16 }
 0x258   :  { %v766_v45 = vpop.permute.xlu0 %765  ;;  %v2069_v14 = vunpack.i.h.bf16 %v2067_v51  ;;  %v2068_v23 = vunpack.i.l.bf16 %v2067_v51  ;;  %v1465_v21 = vor.u32 %v1464_v25, %v1461_v47  ;;  %v1447_v47 = vrot.slane %v1445_v27, 6  ;;  %v2090_v27 = vld [vmem:[#allocation2] sm:$0xff] }
 0x259   :  { %v2895_v50 = vsel %vm3612_vm12, %v2802_v56, %v766_v45  ;;  %v1450_v49 = vrot.slane %v1448_v59, 7  ;;  %vm1294_vm12 = vcmask 1040384  }
 0x25a   :  { %v2904_v36 = vsel %vm3607_vm11, %v2069_v14, %v2073_v57  ;;  %v2914_v13 = vsel %vm3614_vm13, %v2068_v23, %v2069_v14  ;;  %v1434_v57 = vshll.u32 %v2711_v38, 16  ;;  %vm3617_vm11 = vmmov %vm3616_vm9 }
 0x25b   :  { %3613 = vst [vmem:[#allocation17_spill] sm:$0xff] %v2904_v36  ;;  %v1451_v59 = vor.u32 %v1450_v49, %v1447_v47  ;;  %vm3618_vm13 = vmmov %vm3616_vm9 }
 0x25c   :  { %v2885_v2 = vld.sshfl [vmem:[#allocation1] sm:$0xff pattern:$0x73625140]  ;;  %v2887_v9 = vld.sshfl [vmem:[#allocation1 + $0x8] sm:$0xff pattern:$0x73625140]  ;;  %1472 = vrot.lane.b32.xlu2 %v1458_v34, %s2091_s0 }
 0x25d   :  { %v2889_v58 = vld.sshfl [vmem:[#allocation1 + $0x10] sm:$0xff pattern:$0x73625140]  ;;  %v2891_v0 = vld.sshfl [vmem:[#allocation1 + $0x18] sm:$0xff pattern:$0x73625140]  ;;  %1169 = vrot.lane.b32.xlu1 %v1163_v32, %s2105_s11 }
 0x25e   :  { %1679 = vst [vmem:[#allocation1] ss:$4 sm:$0xff] %v2429_v31  ;;  %v2901_v40 = vld.sshfl [vmem:[#allocation1 + $0x20] sm:$0xff pattern:$0x73625140]  ;;  %1474 = vrot.lane.b32.xlu0 %v1465_v21, %s2091_s0  ;;  %v2917_v16 = vpop.permute.xlu2 %858  ;;  %v1500_v34 = vrot.slane %v2755_v18, 5 }
 0x25f   :  { %1610 = vst [vmem:[#allocation1 + $0x20] ss:$4 sm:$0xff] %v2446_v43  ;;  %v762_v20 = vpop.permute.xlu1 %761  ;;  %v1431_v31 = vshrl.u32 %v2711_v38, 16  ;;  %v1539_v18 = vshrl.u32 %v2804_v15, 16 }
 0x260   :  { %3615 = vst [vmem:[#allocation18_spill] sm:$0xff] %v2914_v13  ;;  %v802_v51 = vpop.permute.xlu0 %801  ;;  %v775_v25 = vsel %vm3616_vm9, %v762_v20, %v2802_v56  ;;  %v1501_v13 = vrot.slane %v2757_v28, 5  ;;  %v1542_v56 = vshll.u32 %v2804_v15, 16  ;;  %v1436_v28 = vrot.slane %v1434_v57, 7 }
 0x261   :  { %v1433_v49 = vrot.slane %v1431_v31, 6  ;;  %v1541_v36 = vrot.slane %v1539_v18, 3  ;;  %vm3619_vm9 = vcmask 908288   ;;  %v1532_v57 = vshrl.u32 %v2799_v46, 16 }
 0x262   :  { %v1544_v35 = vrot.slane %v1542_v56, 4  ;;  %vm3622_vm4 = vmmov %vm3619_vm9 }
 0x263   :  { %v1437_v18 = vor.u32 %v1436_v28, %v1433_v49 }
 0x264   :  { %1507 = vrot.lane.b32.xlu2 %v1500_v34, %s2097_s27 }
 0x265   :  { %v2926_v14 = vld.sshfl [vmem:[#allocation1] sm:$0xff pattern:$0x73625140]  ;;  %v2928_v23 = vld.sshfl [vmem:[#allocation1 + $0x8] sm:$0xff pattern:$0x73625140]  ;;  %1470 = vrot.lane.b32.xlu1 %v1451_v59, %s2091_s0 }
 0x266   :  { %v2930_v21 = vld.sshfl [vmem:[#allocation1 + $0x10] sm:$0xff pattern:$0x73625140]  ;;  %v2932_v32 = vld.sshfl [vmem:[#allocation1 + $0x18] sm:$0xff pattern:$0x73625140]  ;;  %1509 = vrot.lane.b32.xlu0 %v1501_v13, %s2097_s27  ;;  %v2945_v47 = vpop.permute.xlu2 %864 }
 0x267   :  { %1711 = vst [vmem:[#allocation1] ss:$4 sm:$0xff] %v2090_v27  ;;  %v2940_v20 = vld.sshfl [vmem:[#allocation1 + $0x20] sm:$0xff pattern:$0x73625140]  ;;  %v768_v38 = vpop.permute.xlu1 %767  ;;  %v1525_v13 = vshrl.u32 %v2797_v3, 16 }
 0x268   :  { %1681 = vst [vmem:[#allocation1 + $0x20] ss:$4 sm:$0xff] %v2446_v43  ;;  %v808_v54 = vpop.permute.xlu0 %807  ;;  %v777_v34 = vsel %vm3617_vm11, %v766_v45, %v768_v38  ;;  %v778_v15 = vsel %vm3618_vm13, %v768_v38, %v2832_v55  ;;  %v1535_v45 = vshll.u32 %v2799_v46, 16  ;;  %vm1312_vm11 = vsmask.f32 2304 }
 0x269   :  { %v813_v59 = vsel %vm3619_vm9, %v2883_v8, %v808_v54  ;;  %v1545_v38 = vor.u32 %v1544_v35, %v1541_v36  ;;  %v1534_v46 = vrot.slane %v1532_v57, 3  ;;  %vm2978_vm13 = vmand %vm3582_vm0, %vm1312_vm11  ;;  %vm3581_vm11 = vcmask 891904  }
 0x26a   :  { %v2956_v31 = vsel %vm1294_vm12, %v777_v34, %v813_v59  ;;  %v1537_v34 = vrot.slane %v1535_v45, 4  ;;  %vm3635_vm0 = vcmask 777216  }
 0x26c   :  { %1503 = vrot.lane.b32.xlu2 %v1498_v10, %s2097_s27  ;;  %v1538_v19 = vor.u32 %v1537_v34, %v1534_v46 }
 0x26d   :  { %1466 = vrot.lane.b32.xlu1 %v1437_v18, %s2091_s0  ;;  %v1527_v18 = vrot.slane %v1525_v13, 3 }
 0x26e   :  { %v2960_v55 = vld.sshfl [vmem:[#allocation1 + $0x8] sm:$0xff pattern:$0x73625140]  ;;  %v2962_v56 = vld.sshfl [vmem:[#allocation1 + $0x18] sm:$0xff pattern:$0x73625140]  ;;  %1564 = vrot.lane.b32.xlu0 %v1545_v38, %s2100_s1  ;;  %v2972_v3 = vpop.permute.xlu2 %892 }
 0x26f   :  { %v2965_v48 = vld.sshfl [vmem:[#allocation1 + $0x20] sm:$0xff pattern:$0x73625140]  ;;  %v2974_v49 = vld.sshfl [vmem:[#allocation1 + $0x10] sm:$0xff pattern:$0x73625140]  ;;  %v804_v28 = vpop.permute.xlu1 %803 }
 0x270   :  { %v2967_v24 = vld.sshfl [vmem:[#allocation1] sm:$0xff pattern:$0x73625140]  ;;  %1713 = vst [vmem:[#allocation1 + $0x20] ss:$4 sm:$0xff] %v2446_v43  ;;  %v861_v35 = vpop.permute.xlu0 %860  ;;  %v811_v36 = vsel %vm3619_vm9, %v802_v51, %v804_v28  ;;  %v812_v59 = vsel %vm3622_vm4, %v804_v28, %v2883_v8  ;;  %v1530_v38 = vrot.slane %v1528_v60, 4 }
 0x271   :  { %1774 = vst [vmem:[#allocation1 + $0x2] ss:$4 sm:$0xff] %v2090_v27  ;;  %v868_v57 = vsel %vm3623_vm10, %v2917_v16, %v861_v35  ;;  %v1297_v45 = vsel %vm1294_vm12, %v775_v25, %v811_v36  ;;  %v1301_v30 = vsel %vm1294_vm12, %v2895_v50, %v812_v59  ;;  %v1556_v27 = vshll.u32 %v2855_v26, 16  ;;  %vm3624_vm10 = vmmov %vm3622_vm4 }
 0x272   :  { %v1314_v51 = vsel %vm2978_vm13, %v1297_v45, %v868_v57  ;;  %v1499_v8 = vrot.slane %v2752_v62, 5  ;;  %v1531_v13 = vor.u32 %v1530_v38, %v1527_v18  ;;  %v1555_v16 = vrot.slane %v1553_v17, 3 }
 0x273   :  { %v1558_v25 = vrot.slane %v1556_v27, 4  ;;  %vm3625_vm4 = vcmask 900096   ;;  %v1546_v59 = vshrl.u32 %v2806_v5, 16  ;;  %v1549_v17 = vshll.u32 %v2806_v5, 16 }
 0x274   :  { %1562 = vrot.lane.b32.xlu2 %v1538_v19, %s2100_s1  ;;  %v1619_v18 = vshll.u32 %v2887_v9, 16  ;;  %vm3626_vm9 = vmmov %vm3625_vm4 }
 0x275   :  { %1505 = vrot.lane.b32.xlu1 %v1499_v8, %s2097_s27  ;;  %v1559_v28 = vor.u32 %v1558_v25, %v1555_v16  ;;  %v1548_v38 = vrot.slane %v1546_v59, 3  ;;  %v1551_v57 = vrot.slane %v1549_v17, 4 }
 0x276   :  { %1560 = vrot.lane.b32.xlu0 %v1531_v13, %s2100_s1  ;;  %v899_v50 = vpop.permute.xlu2 %898  ;;  %v1621_v27 = vrot.slane %v1619_v18, 1 }
 0x277   :  { %v2996_v60 = vld.sshfl [vmem:[#allocation1 + $0x20] sm:$0xff pattern:$0x73625140]  ;;  %v810_v26 = vpop.permute.xlu1 %809  ;;  %v1552_v25 = vor.u32 %v1551_v57, %v1548_v38  ;;  %v1631_v57 = vshrl.u32 %v2885_v2, 16 }
 0x278   :  { %1776 = vst [vmem:[#allocation1 + $0x22] ss:$4 sm:$0xff] %v2446_v43  ;;  %v867_v46 = vpop.permute.xlu0 %866  ;;  %v814_v34 = vsel %vm3624_vm10, %v808_v54, %v810_v26  ;;  %v1502_v43 = vrot.slane %v2810_v7, 5  ;;  %vm3627_vm10 = vmmov %vm3625_vm4 }
 0x279   :  { %v871_v62 = vsel %vm3625_vm4, %v2945_v47, %v867_v46  ;;  %v1309_v19 = vsel %vm1294_vm12, %v778_v15, %v814_v34  ;;  %vm958_vm4 = vcmask 883712  }
 0x27a   :  { %v1317_v36 = vsel %vm2978_vm13, %v1309_v19, %v871_v62  ;;  %v1628_v19 = vshll.u32 %v2940_v20, 16 }
 0x27c   :  { %1568 = vrot.lane.b32.xlu2 %v1559_v28, %s2100_s1  ;;  %v1616_v28 = vshll.u32 %v2885_v2, 16 }
 0x27d   :  { %1511 = vrot.lane.b32.xlu1 %v1502_v43, %s2097_s27  ;;  %v1630_v43 = vrot.slane %v1628_v19, 1 }
 0x27e   :  { %1597 = vrot.lane.b32.xlu0 %v2845_v52, %s2106_s12  ;;  %v953_v54 = vpop.permute.xlu2 %952  ;;  %v1618_v18 = vrot.slane %v1616_v28, 1 }
 0x27f   :  { %v863_v15 = vpop.permute.xlu1 %862 }
 0x280   :  { %v895_v7 = vpop.permute.xlu0 %894  ;;  %v869_v45 = vsel %vm3626_vm9, %v861_v35, %v863_v15  ;;  %v870_v5 = vsel %vm3627_vm10, %v863_v15, %v2945_v47  ;;  %v2075_v35 = vpack.i.bf16 %v1621_v27, %v2526_v41  ;;  %v1622_v47 = vshll.u32 %v2889_v58, 16 }
 0x281   :  { %v902_v8 = vsel %vm3581_vm11, %v2972_v3, %v895_v7  ;;  %v1315_v13 = vsel %vm2978_vm13, %v1301_v30, %v869_v45  ;;  %v1316_v52 = vsel %vm2978_vm13, %v2956_v31, %v870_v5  ;;  %v1637_v41 = vshrl.u32 %v2889_v58, 16 }
 0x282   :  { %v3026_v16 = vsel %vm314_vm7, %v1315_v13, %v902_v8  ;;  %v1624_v34 = vrot.slane %v1622_v47, 1  ;;  %vm3628_vm9 = vcmask 1045504   ;;  %v2085_v45 = vpack.i.bf16 %v1618_v18, %v1630_v43 }
 0x283   :  { %vm3047_vm10 = vmand %vm3628_vm9, %vm503_vm5  ;;  %v1625_v8 = vshll.u32 %v2891_v0, 16  ;;  %v1633_v13 = vor.u32 %v1631_v57, %v1618_v18  ;;  %vm3586_vm5 = vcmask 1046528   ;;  %vm3631_vm9 = vcmask 785408  }
 0x284   :  { %1595 = vrot.lane.b32.xlu2 %v2843_v33, %s2106_s12  ;;  %v1639_v33 = vor.u32 %v1637_v41, %v1624_v34 }
 0x285   :  { %1566 = vrot.lane.b32.xlu1 %v1552_v25, %s2100_s1 }
 0x286   :  { %2076 = vrot.lane.b32.xlu0 %v2075_v35, %s2098_s28  ;;  %v986_v30 = vpop.permute.xlu2 %985  ;;  %v1634_v35 = vshrl.u32 %v2887_v9, 16 }
 0x287   :  { %v891_v26 = vpop.permute.xlu1 %890 }
 0x288   :  { %v949_v46 = vpop.permute.xlu0 %948  ;;  %v901_v31 = vsel %vm3581_vm11, %v891_v26, %v2972_v3 }
 0x289   :  { %v1320_v62 = vsel %vm314_vm7, %v1314_v51, %v901_v31  ;;  %v1636_v31 = vor.u32 %v1634_v35, %v1621_v27  ;;  %v1643_v27 = vshrl.u32 %v2940_v20, 16  ;;  %v1740_v20 = vshrl.u32 %v2962_v56, 16 }
 0x28c   :  { %1601 = vrot.lane.b32.xlu2 %v2901_v40, %s2106_s12 }
 0x28d   :  { %1599 = vrot.lane.b32.xlu1 %v2847_v63, %s2106_s12 }
 0x28e   :  { %1660 = vrot.lane.b32.xlu0 %v1639_v33, %s2098_s28  ;;  %v992_v3 = vpop.permute.xlu2 %991  ;;  %v1645_v33 = vor.u32 %v1643_v27, %v1630_v43 }
 0x28f   :  { %v897_v59 = vpop.permute.xlu1 %896 }
 0x290   :  { %v955_v51 = vpop.permute.xlu0 %954  ;;  %v903_v40 = vsel %vm3581_vm11, %v895_v7, %v897_v59  ;;  %v904_v17 = vsel %vm3581_vm11, %v897_v59, %v899_v50  ;;  %vm3634_vm11 = vmmov %vm3631_vm9 }
 0x291   :  { %v961_v63 = vsel %vm958_vm4, %v953_v54, %v955_v51  ;;  %v1328_v15 = vsel %vm314_vm7, %v1316_v52, %v903_v40  ;;  %v1332_v38 = vsel %vm314_vm7, %v1317_v36, %v904_v17  ;;  %v1627_v36 = vrot.slane %v1625_v8, 1 }
 0x292   :  { %v1338_v5 = vsel %vm3047_vm10, %v1328_v15, %v961_v63  ;;  %v1696_v40 = vrot.slane %v2965_v48, 7  ;;  %v1742_v63 = vrot.slane %v1740_v20, 5  ;;  %v1695_v8 = vrot.slane %v2932_v32, 7 }
 0x293   :  { %v1207_v20 = vshll.u32 %v2650_v22, 16 }
 0x294   :  { %2086 = vrot.lane.b32.xlu2 %v2085_v45, %s2098_s28 }
 0x295   :  { %1593 = vrot.lane.b32.xlu1 %v2841_v11, %s2106_s12 }
 0x296   :  { %1656 = vrot.lane.b32.xlu0 %v1633_v13, %s2098_s28  ;;  %v3064_v50 = vpop.permute.xlu2 %1043  ;;  %v1736_v13 = vshll.u32 %v2974_v49, 16 }
 0x297   :  { %v951_v7 = vpop.permute.xlu1 %950 }
 0x298   :  { %v988_v2 = vpop.permute.xlu0 %987  ;;  %v959_v52 = vsel %vm958_vm4, %v949_v46, %v951_v7  ;;  %v960_v25 = vsel %vm958_vm4, %v951_v7, %v953_v54  ;;  %v2080_v46 = vpack.i.bf16 %v1627_v36, %v1624_v34  ;;  %v1693_v54 = vrot.slane %v2928_v23, 7 }
 0x299   :  { %v3070_v47 = vsel %vm3631_vm9, %v986_v30, %v988_v2  ;;  %v1337_v11 = vsel %vm3047_vm10, %v3026_v16, %v960_v25  ;;  %v1336_v26 = vsel %vm3047_vm10, %v1320_v62, %v959_v52  ;;  %v1640_v34 = vshrl.u32 %v2891_v0, 16 }
 0x29a   :  { %v3079_v41 = vsel %vm3586_vm5, %v1336_v26, %v3070_v47  ;;  %v1694_v7 = vrot.slane %v2930_v21, 7  ;;  %v1738_v25 = vrot.slane %v1736_v13, 6 }
 0x29b   :  { %v1642_v59 = vor.u32 %v1640_v34, %v1627_v36 }
 0x29c   :  { %1658 = vrot.lane.b32.xlu2 %v1636_v31, %s2098_s28 }
 0x29d   :  { %2081 = vrot.lane.b32.xlu1 %v2080_v46, %s2098_s28 }
 0x29e   :  { %1699 = vrot.lane.b32.xlu0 %v1693_v54, %s2092_s22  ;;  %v3085_v9 = vpop.permute.xlu2 %1075 }
 0x29f   :  { %v957_v16 = vpop.permute.xlu1 %956 }
 0x2a0   :  { %v994_v30 = vpop.permute.xlu0 %993  ;;  %v962_v62 = vsel %vm958_vm4, %v955_v51, %v957_v16  ;;  %vm1358_vm4 = vsmask.f32 256  ;;  %v1743_v51 = vshll.u32 %v2962_v56, 16  ;;  %v1692_v16 = vrot.slane %v2926_v14, 7 }
 0x2a1   :  { %v3090_v19 = vsel %vm3631_vm9, %v992_v3, %v994_v30  ;;  %v1339_v23 = vsel %vm3047_vm10, %v1332_v38, %v962_v62  ;;  %vm3108_vm10 = vmand %vm1294_vm12, %vm1358_vm4  ;;  %v1726_v30 = vshrl.u32 %v2960_v55, 16 }
 0x2a2   :  { %v3097_v28 = vsel %vm3586_vm5, %v1339_v23, %v3090_v19  ;;  %v1745_v56 = vrot.slane %v1743_v51, 6  ;;  %vm3637_vm4 = vmmov %vm3635_vm0  ;;  %v1779_v51 = vld.sshfl [vmem:[#allocation1 + $0x8] sm:$0xff pattern:$0x73625140] }
 0x2a3   :  { %v1728_v23 = vrot.slane %v1726_v30, 5 }
 0x2a4   :  { %1664 = vrot.lane.b32.xlu2 %v1645_v33, %s2098_s28  ;;  %v1746_v36 = vor.u32 %v1745_v56, %v1742_v63  ;;  %v1750_v63 = vshll.u32 %v2996_v60, 16  ;;  %v1781_v56 = vld.sshfl [vmem:[#allocation1 + $0x10] sm:$0xff pattern:$0x73625140] }
 0x2a5   :  { %1662 = vrot.lane.b32.xlu1 %v1642_v59, %s2098_s28 }
 0x2a6   :  { %1705 = vrot.lane.b32.xlu0 %v1696_v40, %s2092_s22  ;;  %v3105_v0 = vpop.permute.xlu2 %1134  ;;  %v1204_v40 = vshrl.u32 %v2650_v22, 16 }
 0x2a7   :  { %v990_v58 = vpop.permute.xlu1 %989 }
 0x2a8   :  { %v1046_v48 = vpop.permute.xlu0 %1045  ;;  %v996_v17 = vsel %vm3631_vm9, %v988_v2, %v990_v58  ;;  %v3114_v18 = vsel %vm3634_vm11, %v990_v58, %v992_v3  ;;  %v1733_v3 = vshrl.u32 %v2974_v49, 16  ;;  %v1722_v2 = vshll.u32 %v2967_v24, 16 }
 0x2a9   :  { %v1052_v15 = vsel %vm3635_vm0, %v3064_v50, %v1046_v48  ;;  %v3120_v38 = vsel %vm3586_vm5, %v1338_v5, %v3114_v18  ;;  %v3123_v57 = vsel %vm3586_vm5, %v1337_v11, %v996_v17  ;;  %v1719_v5 = vshrl.u32 %v2967_v24, 16 }
 0x2aa   :  { %v1361_v45 = vsel %vm3108_vm10, %v996_v17, %v1052_v15  ;;  %v1735_v32 = vrot.slane %v1733_v3, 5  ;;  %v1724_v26 = vrot.slane %v1722_v2, 6  ;;  %vm3636_vm11 = vcmask 769024  }
 0x2ab   :  { %v1721_v49 = vrot.slane %v1719_v5, 5  ;;  %v1747_v17 = vshrl.u32 %v2996_v60, 16  ;;  %vm3584_vm9 = vcmask 760832   ;;  %v1209_v15 = vrot.slane %v1207_v20, 2 }
 0x2ac   :  { %1703 = vrot.lane.b32.xlu2 %v1695_v8, %s2092_s22  ;;  %v1739_v54 = vor.u32 %v1738_v25, %v1735_v32  ;;  %v1752_v8 = vrot.slane %v1750_v63, 6  ;;  %vm3666_vm5 = vcmask 1042432  }
 0x2ad   :  { %1701 = vrot.lane.b32.xlu1 %v1694_v7, %s2092_s22  ;;  %v1725_v62 = vor.u32 %v1724_v26, %v1721_v49  ;;  %v1214_v49 = vshll.u32 %v2652_v44, 16  ;;  %v1777_v26 = vld.sshfl [vmem:[#allocation1] sm:$0xff pattern:$0x73625140] }
 0x2ae   :  { %1760 = vrot.lane.b32.xlu0 %v1746_v36, %s2093_s23  ;;  %v3136_v52 = vpop.permute.xlu2 %1171 }
 0x2af   :  { %v1042_v35 = vpop.permute.xlu1 %1041 }
 0x2b0   :  { %v1078_v11 = vpop.permute.xlu0 %1077  ;;  %v3140_v21 = vsel %vm3635_vm0, %v1042_v35, %v3064_v50  ;;  %v1729_v50 = vshll.u32 %v2960_v55, 16  ;;  %vm3583_vm0 = vcmask 752640  }
 0x2b1   :  { %v1084_v31 = vsel %vm3636_vm11, %v3085_v9, %v1078_v11  ;;  %v1360_v24 = vsel %vm3108_vm10, %v3070_v47, %v3140_v21  ;;  %vm3181_vm11 = vmand %vm314_vm7, %vm499_vm14  ;;  %vm3642_vm14 = vcmask 916480  }
 0x2b2   :  { %v3149_v46 = vsel %vm303_vm1, %v1361_v45, %v1084_v31  ;;  %v1731_v33 = vrot.slane %v1729_v50, 6  ;;  %v1749_v45 = vrot.slane %v1747_v17, 5 }
 0x2b4   :  { %1758 = vrot.lane.b32.xlu2 %v1739_v54, %s2093_s23  ;;  %v1732_v58 = vor.u32 %v1731_v33, %v1728_v23  ;;  %v1753_v25 = vor.u32 %v1752_v8, %v1749_v45  ;;  %v1785_v23 = vld.sshfl [vmem:[#allocation1 + $0x20] sm:$0xff pattern:$0x73625140]  ;;  %v1197_v33 = vshrl.u32 %v2648_v29, 16 }
 0x2b5   :  { %1697 = vrot.lane.b32.xlu1 %v1692_v16, %s2092_s22 }
 0x2b6   :  { %1754 = vrot.lane.b32.xlu0 %v1725_v62, %s2093_s23  ;;  %v3157_v27 = vpop.permute.xlu2 %1472  ;;  %v1216_v62 = vrot.slane %v1214_v49, 2 }
 0x2b7   :  { %v3159_v34 = vpop.permute.xlu1 %1047 }
 0x2b8   :  { %v3161_v59 = vpop.permute.xlu0 %1136  ;;  %v1053_v14 = vsel %vm3637_vm4, %v1046_v48, %v3159_v34  ;;  %vm3640_vm4 = vcmask 769024  }
 0x2b9   :  { %v1362_v55 = vsel %vm3108_vm10, %v3114_v18, %v1053_v14  ;;  %v1206_v18 = vrot.slane %v1204_v40, 1  ;;  %v1143_v7 = vsel %vm3584_vm9, %v3105_v0, %v3161_v59  ;;  %v1200_v14 = vshll.u32 %v2648_v29, 16  ;;  %v1783_v40 = vld.sshfl [vmem:[#allocation1 + $0x18] sm:$0xff pattern:$0x73625140] }
 0x2bb   :  { %v1210_v2 = vor.u32 %v1209_v15, %v1206_v18  ;;  %v1095_v18 = vshrl.u32 %v2598_v53, 16  ;;  %v1098_v15 = vshll.u32 %v2598_v53, 16 }
 0x2bc   :  { %1789 = vrot.lane.b32.xlu2 %v1779_v51, %s2102_s8  ;;  %v1199_v51 = vrot.slane %v1197_v33, 1  ;;  %v3641_v33 = vunpack.i.h.bf16 %v2766_v61 }
 0x2bd   :  { %1756 = vrot.lane.b32.xlu1 %v1732_v58, %s2093_s23  ;;  %v1202_v58 = vrot.slane %v1200_v14, 2 }
 0x2be   :  { %1791 = vrot.lane.b32.xlu0 %v1781_v56, %s2102_s8  ;;  %v3175_v48 = vpop.permute.xlu2 %1507  ;;  %v1035_v56 = vshrl.u32 %v2587_v37, 16 }
 0x2bf   :  { %v3177_v22 = vpop.permute.xlu1 %1079  ;;  %v1203_v63 = vor.u32 %v1202_v58, %v1199_v51 }
 0x2c0   :  { %v3185_v3 = vpop.permute.xlu0 %1173  ;;  %v1085_v13 = vsel %vm3640_vm4, %v1078_v11, %v3177_v22  ;;  %v1211_v11 = vshrl.u32 %v2652_v44, 16  ;;  %v1037_v8 = vrot.slane %v1035_v56, 7  ;;  %vm3643_vm4 = vcmask 1031168  }
 0x2c1   :  { %v1180_v36 = vsel %vm3583_vm0, %v3136_v52, %v3185_v3  ;;  %v1374_v5 = vsel %vm303_vm1, %v1362_v55, %v1085_v13 }
 0x2c2   :  { %v1384_v32 = vsel %vm3181_vm11, %v1374_v5, %v1143_v7  ;;  %v1213_v50 = vrot.slane %v1211_v11, 1  ;;  %v1097_v7 = vrot.slane %v1095_v18, 4  ;;  %v1038_v5 = vshll.u32 %v2587_v37, 16 }
 0x2c3   :  { %v3199_v35 = vsel %vm3585_vm2, %v1384_v32, %v1180_v36  ;;  %v1100_v36 = vrot.slane %v1098_v15, 5 }
 0x2c4   :  { %1229 = vrot.lane.b32.xlu2 %v1210_v2, %s2107_s13  ;;  %v1217_v55 = vor.u32 %v1216_v62, %v1213_v50  ;;  %v1040_v2 = vor.u32 %v1038_v5, %v1037_v8 }
 0x2c5   :  { %1762 = vrot.lane.b32.xlu1 %v1753_v25, %s2093_s23 }
 0x2c6   :  { %1787 = vrot.lane.b32.xlu0 %v1777_v26, %s2102_s8  ;;  %v1504_v31 = vpop.permute.xlu2 %1503 }
 0x2c7   :  { %v3206_v54 = vpop.permute.xlu1 %1132 }
 0x2c8   :  { %v3208_v16 = vpop.permute.xlu0 %1468  ;;  %v1142_v30 = vsel %vm3584_vm9, %v3206_v54, %v3105_v0  ;;  %vm1603_vm9 = vcmask 924672  }
 0x2c9   :  { %v1383_v44 = vsel %vm3181_vm11, %v3149_v46, %v1142_v30 }
 0x2cc   :  { %1795 = vrot.lane.b32.xlu2 %v1785_v23, %s2102_s8 }
 0x2cd   :  { %1793 = vrot.lane.b32.xlu1 %v1783_v40, %s2102_s8 }
 0x2ce   :  { %1231 = vrot.lane.b32.xlu0 %v1217_v55, %s2107_s13  ;;  %v3221_v0 = vpop.permute.xlu2 %1562 }
 0x2cf   :  { %v3223_v20 = vpop.permute.xlu1 %1169 }
 0x2d0   :  { %v3225_v46 = vpop.permute.xlu0 %1474  ;;  %v1179_v29 = vsel %vm3583_vm0, %v3223_v20, %v3136_v52  ;;  %vm3644_vm0 = vcmask 1022976  }
 0x2d1   :  { %v3231_v17 = vsel %vm3585_vm2, %v1383_v44, %v1179_v29 }
 0x2d4   :  { %1073 = vrot.lane.b32.xlu2 %v2578_v1, %s2096_s26  ;;  %v1101_v1 = vor.u32 %v1100_v36, %v1097_v7 }
 0x2d5   :  { %1227 = vrot.lane.b32.xlu1 %v1203_v63, %s2107_s13 }
 0x2d6   :  { %1081 = vrot.lane.b32.xlu0 %v2607_v39, %s2096_s26  ;;  %v3241_v45 = vpop.permute.xlu2 %1568 }
 0x2d7   :  { %v1471_v52 = vpop.permute.xlu1 %1470 }
 0x2d8   :  { %v1510_v13 = vpop.permute.xlu0 %1509  ;;  %v1477_v5 = vsel %vm61_vm8, %v3208_v16, %v1471_v52 }
 0x2dd   :  { %1049 = vrot.lane.b32.xlu1 %v1040_v2, %s2095_s25 }
 0x2de   :  { %1130 = vrot.lane.b32.xlu0 %v1101_v1, %s2104_s10  ;;  %v1596_v53 = vpop.permute.xlu2 %1595 }
 0x2df   :  { %v1467_v32 = vpop.permute.xlu1 %1466 }
 0x2e0   :  { %v1565_v25 = vpop.permute.xlu0 %1564  ;;  %v1476_v29 = vsel %vm61_vm8, %v1467_v32, %v3208_v16  ;;  %v1478_v16 = vsel %vm61_vm8, %v1471_v52, %v3157_v27 }
 0x2e1   :  { %v1801_v18 = vsel %vm2416_vm15, %v2673_v12, %v1476_v29  ;;  %v3650_v29 = vld [vmem:[#allocation7_spill] sm:$0xff] }
 0x2e6   :  { %v3246_v11 = vpop.permute.xlu2 %1601 }
 0x2e7   :  { %v1506_v39 = vpop.permute.xlu1 %1505 }
 0x2e8   :  { %v1561_v49 = vpop.permute.xlu0 %1560  ;;  %v1513_v63 = vsel %vm3643_vm4, %v1504_v31, %v1506_v39 }
 0x2e9   :  { %v1570_v61 = vsel %vm3644_vm0, %v1561_v49, %v3221_v0  ;;  %vm3647_vm0 = vmmov %vm3643_vm4  ;;  %vm3648_vm4 = vcmask 1045504  }
 0x2ea   :  { %v1514_v12 = vsel %vm3647_vm0, %v1506_v39, %v3175_v48  ;;  %v1515_v39 = vsel %vm3647_vm0, %v3175_v48, %v1510_v13 }
 0x2ee   :  { %v3248_v26 = vpop.permute.xlu2 %2086 }
 0x2ef   :  { %v3250_v30 = vpop.permute.xlu1 %1511  ;;  %v2089_v7 = vunpack.i.h.bf16 %v3248_v26 }
 0x2f0   :  { %v1598_v50 = vpop.permute.xlu0 %1597 }
 0x2f1   :  { %v1605_v48 = vsel %vm1603_vm9, %v1596_v53, %v1598_v50 }
 0x2f6   :  { %v3252_v62 = vpop.permute.xlu2 %1658 }
 0x2f7   :  { %v1567_v37 = vpop.permute.xlu1 %1566 }
 0x2f8   :  { %v2077_v44 = vpop.permute.xlu0 %2076 }
 0x2f9   :  { %v2078_v23 = vunpack.i.l.bf16 %v2077_v44  ;;  %v2079_v56 = vunpack.i.h.bf16 %v2077_v44 }
 0x2fb   :  { %v3257_v14 = vsel %vm3642_vm14, %v3641_v33, %v2078_v23  ;;  %vm3645_vm14 = vcmask 1042432   ;;  %v1479_v23 = vsel %vm61_vm8, %v3157_v27, %v3225_v46  ;;  %v3653_v27 = vld [vmem:[#allocation8_spill] sm:$0xff]  ;;  %vm3654_vm8 = vmmov %vm3647_vm0 }
 0x2fc   :  { %v1293_v55 = vsel %vm2837_vm3, %v2876_v42, %v3257_v14  ;;  %v1808_v8 = vsel %vm3645_vm14, %v1801_v18, %v1513_v63  ;;  %vm3649_vm14 = vcmask 916480   ;;  %v1802_v63 = vsel %vm2416_vm15, %v3650_v29, %v1477_v5  ;;  %v3652_v18 = vld [vmem:[#allocation9_spill] sm:$0xff] }
 0x2fd   :  { %v1826_v1 = vsel %vm2762_vm6, %v1808_v8, %v1570_v61  ;;  %v1666_v44 = vsel %vm3649_vm14, %v2089_v7, %v2079_v56  ;;  %v1804_v8 = vsel %vm2416_vm15, %v3652_v18, %v1479_v23  ;;  %v1803_v52 = vsel %vm2416_vm15, %v3653_v27, %v1478_v16 }
 0x2fe   :  { %v3263_v40 = vpop.permute.xlu2 %1664  ;;  %v1516_v7 = vsel %vm3654_vm8, %v1510_v13, %v3250_v30  ;;  %vm3655_vm14 = vcmask 1022976   ;;  %vm3660_vm8 = vcmask 1045504  }
 0x2ff   :  { %v1600_v51 = vpop.permute.xlu1 %1599  ;;  %vm3656_vm2 = vmmov %vm3655_vm14 }
 0x300   :  { %v3265_v58 = vpop.permute.xlu0 %1660  ;;  %v1571_v5 = vsel %vm3656_vm2, %v3221_v0, %v1565_v25  ;;  %vm3657_vm0 = vmmov %vm3656_vm2  ;;  %v1607_v23 = vsel %vm1603_vm9, %v1600_v51, %v3246_v11 }
 0x306   :  { %v3275_v15 = vpop.permute.xlu2 %1703 }
 0x307   :  { %v1594_v36 = vpop.permute.xlu1 %1593 }
 0x308   :  { %v3281_v31 = vpop.permute.xlu0 %1656  ;;  %v1604_v32 = vsel %vm1603_vm9, %v1594_v36, %v1596_v53  ;;  %v1572_v36 = vsel %vm3655_vm14, %v1565_v25, %v1567_v37  ;;  %vm3662_vm14 = vmmov %vm3660_vm8 }
 0x309   :  { %v1833_v49 = vsel %vm3648_vm4, %v1826_v1, %v1604_v32  ;;  %vm3651_vm4 = vcmask 1042432   ;;  %v1573_v1 = vsel %vm3657_vm0, %v1567_v37, %v3241_v45  ;;  %v1606_v32 = vsel %vm1603_vm9, %v1598_v50, %v1600_v51  ;;  %vm3661_vm9 = vmmov %vm3660_vm8 }
 0x30a   :  { %v1851_v33 = vsel %vm2837_vm3, %v1833_v49, %v1666_v44  ;;  %v1812_v61 = vsel %vm3651_vm4, %v1802_v63, %v1514_v12  ;;  %v2088_v44 = vunpack.i.l.bf16 %v3248_v26  ;;  %v1816_v13 = vsel %vm3651_vm4, %v1803_v52, %v1515_v39  ;;  %vm3658_vm2 = vmmov %vm3651_vm4 }
 0x30b   :  { %1906 = vrot.lane.b32.xlu1 %v1851_v33, %s2108_s14  ;;  %v1827_v49 = vsel %vm2762_vm6, %v1812_v61, %v1571_v5  ;;  %v1820_v53 = vsel %vm3658_vm2, %v1804_v8, %v1516_v7  ;;  %v1828_v25 = vsel %vm2762_vm6, %v1816_v13, %v1572_v36  ;;  %v3659_v33 = vld [vmem:[#allocation11_spill] sm:$0xff]  ;;  %vm3663_vm0 = vcmask 916480  }
 0x30c   :  { %v1805_v29 = vsel %vm2416_vm15, %v3659_v33, %v3225_v46  ;;  %v1837_v26 = vsel %vm3660_vm8, %v1827_v49, %v1605_v48  ;;  %v1829_v63 = vsel %vm2762_vm6, %v1820_v53, %v1573_v1  ;;  %v1841_v51 = vsel %vm3661_vm9, %v1828_v25, %v1606_v32  ;;  %vm3664_vm4 = vmmov %vm3663_vm0 }
 0x30d   :  { %v1845_v39 = vsel %vm3662_vm14, %v1829_v63, %v1607_v23  ;;  %vm3665_vm2 = vmmov %vm3663_vm0  ;;  %v1824_v27 = vsel %vm3666_vm5, %v1805_v29, %v3250_v30  ;;  %vm3671_vm9 = vcmask 900096   ;;  %vm3672_vm14 = vcmask 891904  }
 0x30e   :  { %v3319_v12 = vpop.permute.xlu2 %1758  ;;  %vm3667_vm15 = vmmov %vm3660_vm8  ;;  %vm3670_vm8 = vcmask 769024   ;;  %v1670_v47 = vsel %vm3665_vm2, %v3281_v31, %v3252_v62 }
 0x30f   :  { %v2082_v0 = vpop.permute.xlu1 %2081  ;;  %vm3669_vm5 = vmmov %vm3663_vm0 }
 0x310   :  { %v1700_v37 = vpop.permute.xlu0 %1699  ;;  %v2084_v50 = vunpack.i.h.bf16 %v2082_v0  ;;  %v2083_v16 = vunpack.i.l.bf16 %v2082_v0 }
 0x312   :  { %v1669_v61 = vsel %vm3663_vm0, %v2084_v50, %v2088_v44  ;;  %v1668_v18 = vsel %vm3664_vm4, %v2083_v16, %v2084_v50  ;;  %v1667_v8 = vsel %vm3665_vm2, %v2079_v56, %v2083_v16  ;;  %v1830_v56 = vsel %vm2762_vm6, %v1824_v27, %v3241_v45  ;;  %vm3674_vm4 = vmmov %vm3671_vm9 }
 0x313   :  { %v1854_v6 = vsel %vm2837_vm3, %v1845_v39, %v1669_v61  ;;  %v1853_v46 = vsel %vm2837_vm3, %v1841_v51, %v1668_v18  ;;  %v1852_v52 = vsel %vm2837_vm3, %v1837_v26, %v1667_v8  ;;  %v1849_v5 = vsel %vm3667_vm15, %v1830_v56, %v3246_v11  ;;  %vm3675_vm15 = vmmov %vm3672_vm14 }
 0x314   :  { %1912 = vrot.lane.b32.xlu1 %v1854_v6, %s2108_s14  ;;  %1910 = vrot.lane.b32.xlu0 %v1853_v46, %s2108_s14  ;;  %v1855_v48 = vsel %vm2837_vm3, %v1849_v5, %v2088_v44  ;;  %vm3668_vm6 = vcmask 908288   ;;  %v1671_v11 = vsel %vm3669_vm5, %v3252_v62, %v3265_v58  ;;  %v3680_v6 = vld [vmem:[#allocation3_spill] sm:$0xff] }
 0x315   :  { %1908 = vrot.lane.b32.xlu2 %v1852_v52, %s2108_s14  ;;  %vm3673_vm0 = vmmov %vm3668_vm6  ;;  %v1162_v46 = vrot.slane %v3680_v6, 3 }
 0x316   :  { %v1790_v30 = vpop.permute.xlu2 %1789  ;;  %vm3677_vm5 = vmmov %vm3673_vm0 }
 0x317   :  { %v1663_v7 = vpop.permute.xlu1 %1662 }
 0x318   :  { %v3356_v36 = vpop.permute.xlu0 %1705 }
 0x31d   :  { %1914 = vrot.lane.b32.xlu2 %v1855_v48, %s2108_s14 }
 0x31e   :  { %v3363_v1 = vpop.permute.xlu2 %1229 }
 0x31f   :  { %v1702_v32 = vpop.permute.xlu1 %1701 }
 0x320   :  { %v1761_v49 = vpop.permute.xlu0 %1760  ;;  %v1708_v23 = vsel %vm3668_vm6, %v1700_v37, %v1702_v32  ;;  %vm3676_vm6 = vmmov %vm3673_vm0  ;;  %v1709_v62 = vsel %vm3677_vm5, %v1702_v32, %v3275_v15  ;;  %vm3688_vm5 = vcmask 891904  }
 0x321   :  { %v1862_v25 = vsel %vm1294_vm12, %v1671_v11, %v1708_v23 }
 0x326   :  { %v3365_v13 = vpop.permute.xlu2 %1795 }
 0x327   :  { %v1698_v2 = vpop.permute.xlu1 %1697 }
 0x328   :  { %v1755_v45 = vpop.permute.xlu0 %1754  ;;  %v1707_v63 = vsel %vm3673_vm0, %v1698_v2, %v1700_v37  ;;  %v1710_v37 = vsel %vm3676_vm6, %v3275_v15, %v3356_v36  ;;  %vm3681_vm0 = vmmov %vm3665_vm2  ;;  %vm1235_vm2 = vcmask 654336   ;;  %v3684_v2 = vld [vmem:[#allocation10_spill] sm:$0xff] }
 0x329   :  { %v1672_v52 = vsel %vm3681_vm0, %v3265_v58, %v1663_v7 }
 0x32a   :  { %v1866_v15 = vsel %vm1294_vm12, %v1672_v52, %v1709_v62 }
 0x32e   :  { %v1074_v0 = vpop.permute.xlu2 %1073 }
 0x32f   :  { %v1083_v44 = vsel %vm3670_vm8, %v1074_v0, %v3085_v9  ;;  %v1757_v53 = vpop.permute.xlu1 %1756  ;;  %vm1404_vm8 = vsmask.f32 6400 }
 0x330   :  { %v1792_v50 = vpop.permute.xlu0 %1791  ;;  %v3380_v16 = vsel %vm303_vm1, %v1360_v24, %v1083_v44  ;;  %v1765_v33 = vsel %vm3671_vm9, %v1757_v53, %v3319_v12  ;;  %v1764_v51 = vsel %vm3674_vm4, %v1755_v45, %v1757_v53  ;;  %v1858_v24 = vsel %vm1294_vm12, %v1670_v47, %v1707_v63  ;;  %vm3678_vm9 = vmmov %vm3674_vm4  ;;  %v3708_v45 = vld [vmem:[#allocation13_spill] sm:$0xff] }
 0x331   :  { %v1798_v29 = vsel %vm3672_vm14, %v1790_v30, %v1792_v50  ;;  %v1877_v9 = vsel %vm2978_vm13, %v1862_v25, %v1765_v33  ;;  %v1876_v61 = vsel %vm2978_vm13, %v1858_v24, %v1764_v51  ;;  %v1766_v31 = vsel %vm3678_vm9, %v3319_v12, %v1761_v49  ;;  %vm3679_vm14 = vmmov %vm3674_vm4 }
 0x332   :  { %v1886_v26 = vsel %vm314_vm7, %v1877_v9, %v1798_v29  ;;  %vm3682_vm4 = vmmov %vm3681_vm0  ;;  %v1878_v11 = vsel %vm2978_vm13, %v1866_v15, %v1766_v31  ;;  %v1221_v33 = vshll.u32 %v3684_v2, 16  ;;  %v3691_v31 = vld [vmem:[#allocation6_spill] sm:$0xff]  ;;  %vm3695_vm0 = vcmask 760832  }
 0x333   :  { %1918 = vrot.lane.b32.xlu2 %v1886_v26, %s2108_s14  ;;  %v1673_v56 = vsel %vm3682_vm4, %v1663_v7, %v3263_v40  ;;  %vm3689_vm9 = vmmov %vm3688_vm5  ;;  %v1874_v26 = vsel %vm1294_vm12, %v3263_v40, %v3356_v36  ;;  %vm3696_vm4 = vcmask 752640  }
 0x334   :  { %v1870_v48 = vsel %vm1294_vm12, %v1673_v56, %v1710_v37  ;;  %v1223_v51 = vrot.slane %v1221_v33, 2  ;;  %v2109_v56 = vmov 65535   ;;  %vm3692_vm12 = vcmask 1044480  }
 0x337   :  { %v1763_v21 = vpop.permute.xlu1 %1762 }
 0x338   :  { %v1788_v39 = vpop.permute.xlu0 %1787  ;;  %v1767_v27 = vsel %vm3679_vm14, %v1761_v49, %v1763_v21  ;;  %v1218_v49 = vshrl.u32 %v3684_v2, 16  ;;  %v1880_v47 = vsel %vm2978_vm13, %v1874_v26, %v1763_v21  ;;  %vm3694_vm14 = vcmask 777216  }
 0x339   :  { %v1797_v18 = vsel %vm3675_vm15, %v1788_v39, %v1790_v30  ;;  %v3683_v30 = vld [vmem:[#allocation4_spill] sm:$0xff]  ;;  %vm3685_vm15 = vcmask 1046528   ;;  %v1879_v58 = vsel %vm2978_vm13, %v1870_v48, %v1767_v27  ;;  %v1895_v62 = vsel %vm314_vm7, %v1880_v47, %v3365_v13 }
 0x33a   :  { %v1883_v8 = vsel %vm314_vm7, %v1876_v61, %v1797_v18  ;;  %v1123_v5 = vshrl.u32 %v3683_v30, 16  ;;  %v1126_v12 = vshll.u32 %v3683_v30, 16  ;;  %vm3419_vm6 = vmand %vm3685_vm15, %vm1404_vm8  ;;  %v1220_v63 = vrot.slane %v1218_v49, 1  ;;  %v3690_v18 = vld [vmem:[#allocation5_spill] sm:$0xff] }
 0x33b   :  { %1916 = vrot.lane.b32.xlu2 %v1883_v8, %s2108_s14  ;;  %v1190_v8 = vshrl.u32 %v3690_v18, 16  ;;  %v1193_v37 = vshll.u32 %v3690_v18, 16  ;;  %v1166_v27 = vrot.slane %v3691_v31, 3  ;;  %v1950_v30 = vsel %vm3692_vm12, 4294967295, %v2109_v56  ;;  %vm3697_vm15 = vmmov %vm3695_vm0  ;;  %v3706_v31 = vld [vmem:[#allocation15_spill] sm:$0xff] }
 0x33c   :  { %v1125_v29 = vrot.slane %v1123_v5, 4  ;;  %v1128_v9 = vrot.slane %v1126_v12, 5  ;;  %v1224_v40 = vor.u32 %v1223_v51, %v1220_v63  ;;  %vm3693_vm13 = vcmask 1045504  }
 0x33d   :  { %v1192_v36 = vrot.slane %v1190_v8, 1  ;;  %v1951_v5 = vsel %vm3693_vm13, %v1950_v30, 0  ;;  %vm1926_vm8 = vcmask 646144  }
 0x33e   :  { %v1129_v61 = vor.u32 %v1128_v9, %v1125_v29 }
 0x33f   :  { %v1794_v32 = vpop.permute.xlu1 %1793 }
 0x340   :  { %v3425_v7 = vpop.permute.xlu0 %1231  ;;  %v1799_v23 = vsel %vm3688_vm5, %v1792_v50, %v1794_v32  ;;  %v1800_v0 = vsel %vm3689_vm9, %v1794_v32, %v3365_v13  ;;  %v1940_v13 = vld [vmem:[%s3557_s4] sm:$0xf]  ;;  %vm3698_vm5 = vcmask 769024   ;;  %vm3700_vm9 = vmmov %vm3692_vm12 }
 0x341   :  { %v3435_v44 = vsel %vm1235_vm2, %v3363_v1, %v3425_v7  ;;  %v1892_v53 = vsel %vm314_vm7, %v1879_v58, %v1800_v0  ;;  %v1889_v25 = vsel %vm314_vm7, %v1878_v11, %v1799_v23 }
 0x342   :  { %1922 = vrot.lane.b32.xlu1 %v1892_v53, %s2108_s14  ;;  %1920 = vrot.lane.b32.xlu0 %v1889_v25, %s2108_s14  ;;  %v1408_v50 = vsel %vm3419_vm6, %v3199_v35, %v3435_v44 }
 0x343   :  { %1167 = vrot.lane.b32.xlu2 %v1162_v46, %s2105_s11 }
 0x347   :  { %v3452_v24 = vpop.permute.xlu1 %1227 }
 0x348   :  { %v1237_v39 = vsel %vm1235_vm2, %v3452_v24, %v3363_v1  ;;  %v1195_v1 = vrot.slane %v1193_v37, 2  ;;  %v1082_v2 = vpop.permute.xlu0 %1081 }
 0x349   :  { %v1407_v10 = vsel %vm3419_vm6, %v3231_v17, %v1237_v39 }
 0x34a   :  { %1138 = vrot.lane.b32.xlu1 %v1129_v61, %s2104_s10  ;;  %1924 = vrot.lane.b32.xlu0 %v1895_v62, %s2108_s14  ;;  %v1196_v21 = vor.u32 %v1195_v1, %v1192_v36  ;;  %v3703_v1 = vld [vmem:[#allocation17_spill] sm:$0xff] }
 0x34b   :  { %1233 = vrot.lane.b32.xlu2 %v1224_v40, %s2107_s13 }
 0x34f   :  { %v1050_v52 = vpop.permute.xlu1 %1049 }
 0x350   :  { %v1131_v58 = vpop.permute.xlu0 %1130  ;;  %v1054_v18 = vsel %vm3694_vm14, %v3159_v34, %v1050_v52 }
 0x351   :  { %v1141_v37 = vsel %vm3695_vm0, %v1131_v58, %v3206_v54  ;;  %v1363_v62 = vsel %vm3108_vm10, %v3090_v19, %v1054_v18  ;;  %vm3699_vm10 = vmmov %vm3696_vm4 }
 0x352   :  { %1225 = vrot.lane.b32.xlu1 %v1196_v21, %s2107_s13  ;;  %1175 = vrot.lane.b32.xlu0 %v1166_v27, %s2105_s11  ;;  %v1382_v35 = vsel %vm3181_vm11, %v3380_v16, %v1141_v37  ;;  %v3705_v21 = vld [vmem:[#allocation16_spill] sm:$0xff] }
 0x353   :  { %v1939_v27 = vld [vmem:[%s3558_s3] sm:$0x3] }
 0x35a   :  { %1943 = vperm.xlu0 %2064, %v1940_v13   ;;  %v3709_v13 = vld [vmem:[#allocation18_spill] sm:$0xff] }
 0x36f   :  { %v1909_v17 = vpop.permute.xlu2 %1908 }
 0x377   :  { %v1915_v6 = vpop.permute.xlu2 %1914 }
 0x37d   :  { %v1907_v12 = vpop.permute.xlu1 %1906 }
 0x37e   :  { %v1927_v49 = vsel %vm1926_vm8, %v1907_v12, %v1909_v17 }
 0x386   :  { %v1913_v23 = vpop.permute.xlu1 %1912  ;;  %v1911_v0 = vpop.permute.xlu0 %1910 }
 0x387   :  { %v1929_v63 = vsel %vm1926_vm8, %v1911_v0, %v1913_v23  ;;  %v1928_v51 = vsel %vm1926_vm8, %v1909_v17, %v1911_v0  ;;  %v1930_v43 = vsel %vm1926_vm8, %v1913_v23, %v1915_v6  ;;  %v3710_v17 = vsel %vm2837_vm3, %v3708_v45, %v3709_v13 }
 0x38d   :  { %v1919_v46 = vpop.permute.xlu2 %1918 }
 0x395   :  { %v1917_v48 = vpop.permute.xlu2 %1916 }
 0x396   :  { %v1931_v15 = vsel %vm1926_vm8, %v1917_v48, %v1919_v46 }
 0x397   :  { %v1953_v32 = vand.u32 %v1951_v5, %v1931_v15 }
 0x399   :  { %1967 = vmatpush.bf16.msrb.mxu1 %v1953_v32 }
 0x39d   :  { %1968 = vmatpush.bf16.msrb.mxu1 %v1927_v49  ;;  %v1168_v26 = vpop.permute.xlu2 %1167 }
 0x39e   :  { %v1178_v40 = vsel %vm3696_vm4, %v1168_v26, %v3223_v20 }
 0x39f   :  { %v1389_v16 = vsel %vm3700_vm9, %v1382_v35, %v1178_v40 }
 0x3a5   :  { %v1234_v36 = vpop.permute.xlu2 %1233 }
 0x3b4   :  { %v1923_v11 = vpop.permute.xlu1 %1922  ;;  %v1921_v53 = vpop.permute.xlu0 %1920 }
 0x3b5   :  { %v1932_v25 = vsel %vm1926_vm8, %v1919_v46, %v1921_v53  ;;  %v1933_v33 = vsel %vm1926_vm8, %v1921_v53, %v1923_v11 }
 0x3b6   :  { %v1956_v29 = vand.u32 %v1951_v5, %v1932_v25  ;;  %v1959_v9 = vand.u32 %v1951_v5, %v1933_v33 }
 0x3b8   :  { %1980 = vmatpush.bf16.msrb.mxu2 %v1956_v29  ;;  %1993 = vmatpush.bf16.msrb.mxu3 %v1959_v9 }
 0x3bc   :  { %v1139_v47 = vpop.permute.xlu1 %1138  ;;  %1994 = vmatpush.bf16.msrb.mxu3 %v1929_v63  ;;  %v1925_v39 = vpop.permute.xlu0 %1924  ;;  %1981 = vmatpush.bf16.msrb.mxu2 %v1928_v51 }
 0x3bd   :  { %v1934_v61 = vsel %vm1926_vm8, %v1923_v11, %v1925_v39  ;;  %v1144_v34 = vsel %vm3697_vm15, %v3161_v59, %v1139_v47 }
 0x3be   :  { %v1962_v8 = vand.u32 %v1951_v5, %v1934_v61 }
 0x3c0   :  { %1982 = vmatpush.bf16.msrb.mxu2 %v1407_v10  ;;  %1995 = vmatpush.bf16.msrb.mxu3 %v1408_v50  ;;  %v1086_v10 = vsel %vm3698_vm5, %v3177_v22, %v1082_v2 }
 0x3c1   :  { %2006 = vmatpush.bf16.msra.mxu0 %v1962_v8  ;;  %v1378_v54 = vsel %vm303_vm1, %v1363_v62, %v1086_v10  ;;  %vm3701_vm1 = vmmov %vm3700_vm9 }
 0x3c2   :  { %v1385_v59 = vsel %vm3181_vm11, %v1378_v54, %v1144_v34  ;;  %vm1946_vm11 = vcmask 613376  }
 0x3c4   :  { %v1226_v44 = vpop.permute.xlu1 %1225  ;;  %1996 = vmatpush.bf16.msrb.mxu3 %v3120_v38  ;;  %v1176_v19 = vpop.permute.xlu0 %1175  ;;  %1983 = vmatpush.bf16.msrb.mxu2 %v3123_v57  ;;  %v1239_v38 = vsel %vm1235_vm2, %v3425_v7, %v1234_v36  ;;  %v3707_v7 = vsel %vm2837_vm3, %v3705_v21, %v3706_v31 }
 0x3c5   :  { %v1236_v22 = vsel %vm1235_vm2, %v1226_v44, %v3452_v24  ;;  %v1181_v20 = vsel %vm3699_vm10, %v3185_v3, %v1176_v19  ;;  %2007 = vmatpush.bf16.msra.mxu0 %v1930_v43  ;;  %v3702_v24 = vld [vmem:[#allocation14_spill] sm:$0xff] }
 0x3c6   :  { %v1406_v57 = vsel %vm3419_vm6, %v1389_v16, %v1236_v22  ;;  %v1401_v50 = vsel %vm3701_vm1, %v1385_v59, %v1181_v20  ;;  %v3704_v3 = vsel %vm2837_vm3, %v3702_v24, %v3703_v1 }
 0x3c7   :  { %1969 = vmatpush.bf16.msrb.mxu1 %v1406_v57  ;;  %v1409_v60 = vsel %vm3419_vm6, %v1401_v50, %v1239_v38 }
 0x3c8   :  { %1984 = vmatpush.bf16.msrb.mxu2 %v3704_v3  ;;  %1997 = vmatpush.bf16.msrb.mxu3 %v3707_v7 }
 0x3c9   :  { %2008 = vmatpush.bf16.msra.mxu0 %v1409_v60 }
 0x3cb   :  { %1970 = vmatpush.bf16.msrb.mxu1 %v3079_v41  ;;  %2042 = vmatmul.msk.bf16.vlgmr.msrb.gmra.mxu2 %vm1946_vm11, %v1939_v27 }
 0x3cc   :  { %2043 = vmatmul.msk.bf16.vlgmr.msrb.gmra.mxu3 %vm1946_vm11, %v1939_v27  ;;  %v1944_v6 = vpop.permute.xlu0 %1943 }
 0x3cd   :  { %2009 = vmatpush.bf16.msra.mxu0 %v3097_v28 }
 0x3cf   :  { %1971 = vmatpush.bf16.msrb.mxu1 %v3710_v17 }
 0x3d1   :  { %2010 = vmatpush.bf16.msra.mxu0 %v1293_v55 }
 0x3d2   :  { %2041 = vmatmul.msk.bf16.vlgmr.msrb.gmra.mxu1 %vm1946_vm11, %v1939_v27 }
 0x3d4   :  { %2044 = vmatmul.msk.bf16.vlgmr.msra.gmra.mxu0 %vm1946_vm11, %v1939_v27 }
 0x44e   :  { %v1986_v41 = vpop.f32.mrf.mxu2 }
 0x44f   :  { %v1987_v46 = vadd.f32 %v1986_v41, %v1944_v6  ;;  %v1999_v52 = vpop.f32.mrf.mxu3  ;;  %v1973_v56 = vpop.f32.mrf.mxu1 }
 0x450   :  { %v1974_v28 = vadd.f32 %v1973_v56, %v1944_v6  ;;  %v2000_v48 = vadd.f32 %v1999_v52, %v1944_v6 }
 0x451   :  { %v2017_v30 = vmax.f32 %v1987_v46, 0.0  ;;  %v2012_v5 = vpop.f32.mrf.mxu0 }
 0x452   :  { %v2016_v15 = vmax.f32 %v1974_v28, 0.0  ;;  %v2013_v32 = vadd.f32 %v2012_v5, %v1944_v6  ;;  %v2018_v49 = vmax.f32 %v2000_v48, 0.0 }
 0x453   :  { %v2024_v12 = vrot.slane %v2017_v30, 4 }
 0x454   :  { %v2019_v2 = vmax.f32 %v2013_v32, 0.0 }
 0x455   :  { %v2026_v4 = vsel %vm314_vm7, %v2016_v15, %v2024_v12 }
 0x456   :  { %2030 = vst [vmem:[%s3559_s5] sm:$0xff] %v2026_v4  ;;  %v2025_v42 = vrot.slane %v2019_v2, 4  ;;  %v1988_v14 = vpop.f32.mrf.mxu2 }
 0x457   :  { %v2001_v55 = vpop.f32.mrf.mxu3  ;;  %v1975_v58 = vpop.f32.mrf.mxu1 }
 0x458   :  { %v2027_v23 = vsel %vm314_vm7, %v2018_v49, %v2025_v42 }
 0x459   :  { %2031 = vst [vmem:[%s3559_s5 + $0x8] sm:$0xff] %v2027_v23  ;;  %v2014_v0 = vpop.f32.mrf.mxu0 }

</bundles_post_ra>
